<compile_context>
chip_gen: v7x
topology: tpu7x:2x2x1
jax: 0.10.0
libtpu: 0.0.40
codegen_flags: <defaults>
</compile_context>

<pallas_src>
import functools
import math

import jax
import jax.numpy as jnp
from jax.experimental import pallas as pl
from jax.experimental.pallas import tpu as pltpu


# ---------------------------------------------------------------------------
# Single fused kernel: QKV projections -> batched-head attention -> fc +
# residual + LayerNorm, plus the head-averaged transposed attention map.
# One grid step per batch block.
# ---------------------------------------------------------------------------
def _fused_attention_kernel(
    xq_ref, xk_ref, xv_ref,              # (Bb, S, F) f32 activations
    wq_ref, wk_ref, wv_ref,              # (F, F) bf16 weights (wq pre-scaled)
    wfc_ref,                             # (H, d, F) bf16 fc weight, per head
    p_ref, pt_ref,                       # (S, S) f32 one-hot row permutations
    gamma_ref, beta_ref,                 # (1, F) f32 LayerNorm params
    out_ref, attn_ref,                   # outputs: (Bb, S, F) / (Bb, S, S)
    qh_s, kh_s, vh_s,                    # (Bb, H, S, d) bf16 head scratch
    *, num_head, size_per_head, eps):
    Bb, S, F = xq_ref.shape
    H = num_head
    d = size_per_head
    Sh = S // H
    inv_head = 1.0 / H

    p_mat = p_ref[...]                   # P[p, i] = 1  iff  i == pi(p)
    pt_mat = pt_ref[...]                 # P^T
    gamma = gamma_ref[...]
    beta = beta_ref[...]

    for b in range(Bb):                  # static unroll (Bb is 1 or 2 here)
        res = xq_ref[b]                  # (S, F) f32 residual (torch: res = query)

        # ---- Q/K/V projections: bf16 MXU operands, f32 accumulation ------
        # 1/sqrt(d) is already folded into wq on the host.
        q = jnp.dot(res.astype(jnp.bfloat16), wq_ref[...],
                    preferred_element_type=jnp.float32).astype(jnp.bfloat16)
        k = jnp.dot(xk_ref[b].astype(jnp.bfloat16), wk_ref[...],
                    preferred_element_type=jnp.float32).astype(jnp.bfloat16)
        v = jnp.dot(xv_ref[b].astype(jnp.bfloat16), wv_ref[...],
                    preferred_element_type=jnp.float32).astype(jnp.bfloat16)

        # ---- torch `.view(B, H, -1, d)` head split -----------------------
        # Head h of the flat row-major projection occupies rows
        # [h*Sh, (h+1)*Sh) of the (S, F) matrix.  Assemble each head in a
        # fixed block-permuted row order (chunk-major): only H contiguous
        # (Sh, d) block copies per head/tensor.  The row permutation is the
        # same for every head and is undone below with one-hot matmuls.
        for h in range(H):
            rows = slice(h * Sh, (h + 1) * Sh)
            for r in range(H):
                cols = slice(r * d, (r + 1) * d)
                dst = slice(r * Sh, (r + 1) * Sh)
                qh_s[b, h, dst, :] = q[rows, cols]
                kh_s[b, h, dst, :] = k[rows, cols]
                vh_s[b, h, dst, :] = v[rows, cols]

        qh = qh_s[b]                     # (H, S, d) bf16, permuted row order
        kh = kh_s[b]
        vh = vh_s[b]

        # ---- batched-head attention (softmax in f32) ---------------------
        energy = jnp.einsum('hqd,hkd->hqk', qh, kh,
                            preferred_element_type=jnp.float32)   # (H, S, S)
        m = jnp.max(energy, axis=-1, keepdims=True)
        pnum = jnp.exp(energy - m)
        l = jnp.sum(pnum, axis=-1, keepdims=True)
        attn = pnum / l                  # exact: this map is a returned output
        ctx = jnp.einsum('hqk,hkd->hqd', attn.astype(jnp.bfloat16), vh,
                         preferred_element_type=jnp.float32)      # (H, S, d)

        # ---- head-averaged, transposed attention map ---------------------
        # a_perm is in permuted coords on both axes; P^T . a_perm . P is the
        # true-coordinate head sum, transposed afterwards (torch: permute).
        a_perm = jnp.sum(attn, axis=0)                            # (S, S) f32
        a_true = jnp.dot(pt_mat,
                         jnp.dot(a_perm, p_mat,
                                 preferred_element_type=jnp.float32),
                         preferred_element_type=jnp.float32)
        attn_ref[b] = a_true.T * inv_head

        # ---- fc folded over heads (no (S,F) context materialization) -----
        # torch: x.permute(0,2,1,3).view(B,-1,F) @ Wfc
        #   == sum_h ctx[h] @ Wfc[h*d:(h+1)*d, :]
        y_perm = jnp.sum(
            jnp.einsum('hqd,hdf->hqf', ctx.astype(jnp.bfloat16), wfc_ref[...],
                       preferred_element_type=jnp.float32),
            axis=0)                                               # (S, F) f32
        # undo the head-row permutation (exact one-hot matmul on the MXU)
        y = jnp.dot(pt_mat, y_perm, preferred_element_type=jnp.float32)

        # dropout = identity (eval); residual add then LayerNorm (two-pass var)
        y = y + res
        mu = jnp.mean(y, axis=-1, keepdims=True)
        yc = y - mu
        var = jnp.mean(yc * yc, axis=-1, keepdims=True)
        out_ref[b] = (yc * jax.lax.rsqrt(var + eps)) * gamma + beta


# ---------------------------------------------------------------------------
# Wrapper
# ---------------------------------------------------------------------------
def attention_forward(query, key, value, params, num_head, *, eps=1e-5):
    wq_t, wk_t, wv_t, wfc_t, gamma, beta = params
    B, S, F = query.shape
    d = F // num_head
    assert d * num_head == F
    assert S % num_head == 0, "kernel requires num_head | seq_len"
    Sh = S // num_head

    # bf16 MXU operands (f32 accumulation happens in-kernel); 1/sqrt(d) is
    # folded into the Q weight on the host; fc weight pre-split per head.
    wq_bf = (wq_t * (1.0 / math.sqrt(d))).astype(jnp.bfloat16)
    wk_bf = wk_t.astype(jnp.bfloat16)
    wv_bf = wv_t.astype(jnp.bfloat16)
    wfc_bf = wfc_t.reshape(num_head, d, F).astype(jnp.bfloat16)

    # One-hot row-permutation matrix: permuted head-row p  ->  torch row pi(p).
    rows = jnp.arange(S)
    pi = (rows % Sh) * num_head + rows // Sh
    p_mat = jax.nn.one_hot(pi, S, dtype=jnp.float32)      # (S, S)
    pt_mat = p_mat.T

    # Batch blocking: 2 grid steps when B is even (both v7x TensorCores busy,
    # per-step overhead amortized for larger B); otherwise one elem per step.
    if B % 2 == 0:
        nb, Bb = 2, B // 2
    else:
        nb, Bb = B, 1

    act_spec = pl.BlockSpec((Bb, S, F), lambda i: (i, 0, 0))
    w_spec = pl.BlockSpec((F, F), lambda i: (0, 0))          # resident
    wfc_spec = pl.BlockSpec((num_head, d, F), lambda i: (0, 0, 0))
    perm_spec = pl.BlockSpec((S, S), lambda i: (0, 0))
    vec_spec = pl.BlockSpec((1, F), lambda i: (0, 0))
    out_spec = pl.BlockSpec((Bb, S, F), lambda i: (i, 0, 0))
    attn_spec = pl.BlockSpec((Bb, S, S), lambda i: (i, 0, 0))

    kernel = functools.partial(_fused_attention_kernel,
                               num_head=num_head, size_per_head=d, eps=eps)

    out, attn = pl.pallas_call(
        kernel,
        grid=(nb,),
        in_specs=[act_spec, act_spec, act_spec,
                  w_spec, w_spec, w_spec, wfc_spec,
                  perm_spec, perm_spec, vec_spec, vec_spec],
        out_specs=[out_spec, attn_spec],
        out_shape=[jax.ShapeDtypeStruct((B, S, F), jnp.float32),
                   jax.ShapeDtypeStruct((B, S, S), jnp.float32)],
        scratch_shapes=[
            pltpu.VMEM((Bb, num_head, S, d), jnp.bfloat16),   # per-head Q
            pltpu.VMEM((Bb, num_head, S, d), jnp.bfloat16),   # per-head K
            pltpu.VMEM((Bb, num_head, S, d), jnp.bfloat16),   # per-head V
        ],
        compiler_params=pltpu.CompilerParams(
            dimension_semantics=("parallel",)),
    )(query, key, value, wq_bf, wk_bf, wv_bf, wfc_bf,
      p_mat, pt_mat, gamma, beta)

    return out, attn


# ---------------------------------------------------------------------------
# Pure-JAX f32 reference (mirrors the torch forward) for a numerical check.
# ---------------------------------------------------------------------------
def attention_reference(query, key, value, params, num_head):
    wq_t, wk_t, wv_t, wfc_t, gamma, beta = params
    B, S, F = query.shape
    d = F // num_head
    res = query
    q = (query @ wq_t).reshape(B, num_head, -1, d)
    k = (key @ wk_t).reshape(B, num_head, -1, d)
    v = (value @ wv_t).reshape(B, num_head, -1, d)
    energy = jnp.einsum('bhqd,bhkd->bhqk', q, k) / math.sqrt(d)
    attn = jax.nn.softmax(energy, axis=-1)
    x = jnp.einsum('bhqk,bhkd->bhqd', attn, v)
    x = jnp.transpose(x, (0, 2, 1, 3)).reshape(B, -1, F)
    attn_out = jnp.transpose(attn.sum(axis=1), (0, 2, 1)) / num_head
    x = x @ wfc_t
    x = x + res
    mu = x.mean(-1, keepdims=True)
    var = ((x - mu) ** 2).mean(-1, keepdims=True)
    x = (x - mu) / jnp.sqrt(var + 1e-5) * gamma.reshape(F) + beta.reshape(F)
    return x, attn_out


if __name__ == "__main__":
    B, S, F, H = 2, 8, 32, 4   # in_feature=32, num_head=4, size_per_head=8

    root = jax.random.PRNGKey(0)
    ks = jax.random.split(root, 7)
    query = jax.random.normal(ks[0], (B, S, F), jnp.float32)
    key_in = jax.random.normal(ks[1], (B, S, F), jnp.float32)
    value = jax.random.normal(ks[2], (B, S, F), jnp.float32)

    bound = 1.0 / math.sqrt(F)
    wq = jax.random.uniform(ks[3], (F, F), jnp.float32, -bound, bound)
    wk = jax.random.uniform(ks[4], (F, F), jnp.float32, -bound, bound)
    wv = jax.random.uniform(ks[5], (F, F), jnp.float32, -bound, bound)
    wfc = jax.random.uniform(ks[6], (F, F), jnp.float32, -bound, bound)
    gamma = jnp.ones((1, F), jnp.float32)   # LayerNorm weight init
    beta = jnp.zeros((1, F), jnp.float32)   # LayerNorm bias init

    # Pass pre-transposed linear weights so the kernel computes x @ W.
    params = (wq.T, wk.T, wv.T, wfc.T, gamma, beta)

    out, attn = attention_forward(query, key_in, value, params, H)
    out, attn = jax.block_until_ready((out, attn))

    ref_out, ref_attn = attention_reference(query, key_in, value, params, H)
    assert out.shape == (B, S, F) and attn.shape == (B, S, S)
    # Tolerance covers the bf16 MXU operands (f32 accumulation); the
    # reference is pure f32.
    assert jnp.allclose(out, ref_out, atol=3e-2, rtol=3e-2)
    assert jnp.allclose(attn, ref_attn, atol=2e-2, rtol=2e-2)

    print("KERNEL_OK")
</pallas_src>

<mosaic_0001>
module attributes {stable_mosaic.version = 11 : i64} {
  func.func @_fused_attention_kernel(%arg0: i32, %arg1: memref<1x8x32xf32, #tpu.memory_space<vmem>>, %arg2: memref<1x8x32xf32, #tpu.memory_space<vmem>>, %arg3: memref<1x8x32xf32, #tpu.memory_space<vmem>>, %arg4: memref<32x32xbf16, #tpu.memory_space<vmem>>, %arg5: memref<32x32xbf16, #tpu.memory_space<vmem>>, %arg6: memref<32x32xbf16, #tpu.memory_space<vmem>>, %arg7: memref<4x8x32xbf16, #tpu.memory_space<vmem>>, %arg8: memref<8x8xf32, #tpu.memory_space<vmem>>, %arg9: memref<8x8xf32, #tpu.memory_space<vmem>>, %arg10: memref<1x32xf32, #tpu.memory_space<vmem>>, %arg11: memref<1x32xf32, #tpu.memory_space<vmem>>, %arg12: memref<1x8x32xf32, #tpu.memory_space<vmem>>, %arg13: memref<1x8x8xf32, #tpu.memory_space<vmem>>, %arg14: memref<1x4x8x8xbf16, #tpu.memory_space<vmem>>, %arg15: memref<1x4x8x8xbf16, #tpu.memory_space<vmem>>, %arg16: memref<1x4x8x8xbf16, #tpu.memory_space<vmem>>) attributes {dimension_semantics = [#tpu.dimension_semantics<parallel>], iteration_bounds = array<i64: 2>, scalar_prefetch = 0 : i64, scratch_operands = 3 : i64, tpu.core_type = #tpu.core_type<tc>, window_params = [{transform_indices = @transform_0, window_bounds = array<i64: 1, 8, 32>}, {transform_indices = @transform_1, window_bounds = array<i64: 1, 8, 32>}, {transform_indices = @transform_2, window_bounds = array<i64: 1, 8, 32>}, {pipeline_mode = #tpu.pipeline_mode<synchronous>, transform_indices = @transform_3, window_bounds = array<i64: 32, 32>}, {pipeline_mode = #tpu.pipeline_mode<synchronous>, transform_indices = @transform_4, window_bounds = array<i64: 32, 32>}, {pipeline_mode = #tpu.pipeline_mode<synchronous>, transform_indices = @transform_5, window_bounds = array<i64: 32, 32>}, {pipeline_mode = #tpu.pipeline_mode<synchronous>, transform_indices = @transform_6, window_bounds = array<i64: 4, 8, 32>}, {pipeline_mode = #tpu.pipeline_mode<synchronous>, transform_indices = @transform_7, window_bounds = array<i64: 8, 8>}, {pipeline_mode = #tpu.pipeline_mode<synchronous>, transform_indices = @transform_8, window_bounds = array<i64: 8, 8>}, {pipeline_mode = #tpu.pipeline_mode<synchronous>, transform_indices = @transform_9, window_bounds = array<i64: 1, 32>}, {pipeline_mode = #tpu.pipeline_mode<synchronous>, transform_indices = @transform_10, window_bounds = array<i64: 1, 32>}, {transform_indices = @transform_11, window_bounds = array<i64: 1, 8, 32>}, {transform_indices = @transform_12, window_bounds = array<i64: 1, 8, 8>}]} {
    %c0 = arith.constant 0 : index
    %c0_0 = arith.constant 0 : index
    %0 = vector.load %arg8[%c0, %c0_0] : memref<8x8xf32, #tpu.memory_space<vmem>>, vector<8x8xf32>
    %c0_1 = arith.constant 0 : index
    %c0_2 = arith.constant 0 : index
    %1 = vector.load %arg9[%c0_1, %c0_2] : memref<8x8xf32, #tpu.memory_space<vmem>>, vector<8x8xf32>
    %c0_3 = arith.constant 0 : index
    %c0_4 = arith.constant 0 : index
    %2 = vector.load %arg10[%c0_3, %c0_4] : memref<1x32xf32, #tpu.memory_space<vmem>>, vector<1x32xf32>
    %c0_5 = arith.constant 0 : index
    %c0_6 = arith.constant 0 : index
    %3 = vector.load %arg11[%c0_5, %c0_6] : memref<1x32xf32, #tpu.memory_space<vmem>>, vector<1x32xf32>
    %c0_7 = arith.constant 0 : index
    %c0_8 = arith.constant 0 : index
    %c0_9 = arith.constant 0 : index
    %4 = vector.load %arg1[%c0_7, %c0_8, %c0_9] : memref<1x8x32xf32, #tpu.memory_space<vmem>>, vector<1x8x32xf32>
    %5 = vector.shape_cast %4 : vector<1x8x32xf32> to vector<8x32xf32>
    %6 = arith.truncf %5 : vector<8x32xf32> to vector<8x32xbf16>
    %c0_10 = arith.constant 0 : index
    %c0_11 = arith.constant 0 : index
    %7 = vector.load %arg4[%c0_10, %c0_11] : memref<32x32xbf16, #tpu.memory_space<vmem>>, vector<32x32xbf16>
    %cst = arith.constant dense<0.000000e+00> : vector<8x32xf32>
    %8 = tpu.matmul %6, %7, %cst {dimension_numbers = #tpu.dot_dimension_numbers<[1], [0], [0], [1], [0, 0, 1, 1], [], []>} : vector<8x32xbf16>, vector<32x32xbf16>, vector<8x32xf32> -> vector<8x32xf32>
    %9 = arith.truncf %8 : vector<8x32xf32> to vector<8x32xbf16>
    %c0_12 = arith.constant 0 : index
    %c0_13 = arith.constant 0 : index
    %c0_14 = arith.constant 0 : index
    %10 = vector.load %arg2[%c0_12, %c0_13, %c0_14] : memref<1x8x32xf32, #tpu.memory_space<vmem>>, vector<1x8x32xf32>
    %11 = vector.shape_cast %10 : vector<1x8x32xf32> to vector<8x32xf32>
    %12 = arith.truncf %11 : vector<8x32xf32> to vector<8x32xbf16>
    %c0_15 = arith.constant 0 : index
    %c0_16 = arith.constant 0 : index
    %13 = vector.load %arg5[%c0_15, %c0_16] : memref<32x32xbf16, #tpu.memory_space<vmem>>, vector<32x32xbf16>
    %cst_17 = arith.constant dense<0.000000e+00> : vector<8x32xf32>
    %14 = tpu.matmul %12, %13, %cst_17 {dimension_numbers = #tpu.dot_dimension_numbers<[1], [0], [0], [1], [0, 0, 1, 1], [], []>} : vector<8x32xbf16>, vector<32x32xbf16>, vector<8x32xf32> -> vector<8x32xf32>
    %15 = arith.truncf %14 : vector<8x32xf32> to vector<8x32xbf16>
    %c0_18 = arith.constant 0 : index
    %c0_19 = arith.constant 0 : index
    %c0_20 = arith.constant 0 : index
    %16 = vector.load %arg3[%c0_18, %c0_19, %c0_20] : memref<1x8x32xf32, #tpu.memory_space<vmem>>, vector<1x8x32xf32>
    %17 = vector.shape_cast %16 : vector<1x8x32xf32> to vector<8x32xf32>
    %18 = arith.truncf %17 : vector<8x32xf32> to vector<8x32xbf16>
    %c0_21 = arith.constant 0 : index
    %c0_22 = arith.constant 0 : index
    %19 = vector.load %arg6[%c0_21, %c0_22] : memref<32x32xbf16, #tpu.memory_space<vmem>>, vector<32x32xbf16>
    %cst_23 = arith.constant dense<0.000000e+00> : vector<8x32xf32>
    %20 = tpu.matmul %18, %19, %cst_23 {dimension_numbers = #tpu.dot_dimension_numbers<[1], [0], [0], [1], [0, 0, 1, 1], [], []>} : vector<8x32xbf16>, vector<32x32xbf16>, vector<8x32xf32> -> vector<8x32xf32>
    %21 = arith.truncf %20 : vector<8x32xf32> to vector<8x32xbf16>
    %22 = vector.extract_strided_slice %9 {offsets = [0, 0], sizes = [2, 8], strides = [1, 1]} : vector<8x32xbf16> to vector<2x8xbf16>
    %c0_24 = arith.constant 0 : index
    %c0_25 = arith.constant 0 : index
    %c0_26 = arith.constant 0 : index
    %c0_27 = arith.constant 0 : index
    %23 = vector.load %arg14[%c0_24, %c0_25, %c0_26, %c0_27] : memref<1x4x8x8xbf16, #tpu.memory_space<vmem>>, vector<1x1x2x8xbf16>
    %24 = vector.shape_cast %23 : vector<1x1x2x8xbf16> to vector<2x8xbf16>
    %25 = vector.shape_cast %22 : vector<2x8xbf16> to vector<1x1x2x8xbf16>
    tpu.vector_store %arg14[%c0_24, %c0_25, %c0_26, %c0_27], %25 {strides = array<i32>} : memref<1x4x8x8xbf16, #tpu.memory_space<vmem>>, vector<1x1x2x8xbf16>,
    %26 = vector.extract_strided_slice %15 {offsets = [0, 0], sizes = [2, 8], strides = [1, 1]} : vector<8x32xbf16> to vector<2x8xbf16>
    %c0_28 = arith.constant 0 : index
    %c0_29 = arith.constant 0 : index
    %c0_30 = arith.constant 0 : index
    %c0_31 = arith.constant 0 : index
    %27 = vector.load %arg15[%c0_28, %c0_29, %c0_30, %c0_31] : memref<1x4x8x8xbf16, #tpu.memory_space<vmem>>, vector<1x1x2x8xbf16>
    %28 = vector.shape_cast %27 : vector<1x1x2x8xbf16> to vector<2x8xbf16>
    %29 = vector.shape_cast %26 : vector<2x8xbf16> to vector<1x1x2x8xbf16>
    tpu.vector_store %arg15[%c0_28, %c0_29, %c0_30, %c0_31], %29 {strides = array<i32>} : memref<1x4x8x8xbf16, #tpu.memory_space<vmem>>, vector<1x1x2x8xbf16>,
    %30 = vector.extract_strided_slice %21 {offsets = [0, 0], sizes = [2, 8], strides = [1, 1]} : vector<8x32xbf16> to vector<2x8xbf16>
    %c0_32 = arith.constant 0 : index
    %c0_33 = arith.constant 0 : index
    %c0_34 = arith.constant 0 : index
    %c0_35 = arith.constant 0 : index
    %31 = vector.load %arg16[%c0_32, %c0_33, %c0_34, %c0_35] : memref<1x4x8x8xbf16, #tpu.memory_space<vmem>>, vector<1x1x2x8xbf16>
    %32 = vector.shape_cast %31 : vector<1x1x2x8xbf16> to vector<2x8xbf16>
    %33 = vector.shape_cast %30 : vector<2x8xbf16> to vector<1x1x2x8xbf16>
    tpu.vector_store %arg16[%c0_32, %c0_33, %c0_34, %c0_35], %33 {strides = array<i32>} : memref<1x4x8x8xbf16, #tpu.memory_space<vmem>>, vector<1x1x2x8xbf16>,
    %34 = vector.extract_strided_slice %9 {offsets = [0, 8], sizes = [2, 8], strides = [1, 1]} : vector<8x32xbf16> to vector<2x8xbf16>
    %c0_36 = arith.constant 0 : index
    %c0_37 = arith.constant 0 : index
    %c2 = arith.constant 2 : index
    %c0_38 = arith.constant 0 : index
    %35 = vector.load %arg14[%c0_36, %c0_37, %c2, %c0_38] : memref<1x4x8x8xbf16, #tpu.memory_space<vmem>>, vector<1x1x2x8xbf16>
    %36 = vector.shape_cast %35 : vector<1x1x2x8xbf16> to vector<2x8xbf16>
    %37 = vector.shape_cast %34 : vector<2x8xbf16> to vector<1x1x2x8xbf16>
    tpu.vector_store %arg14[%c0_36, %c0_37, %c2, %c0_38], %37 {strides = array<i32>} : memref<1x4x8x8xbf16, #tpu.memory_space<vmem>>, vector<1x1x2x8xbf16>,
    %38 = vector.extract_strided_slice %15 {offsets = [0, 8], sizes = [2, 8], strides = [1, 1]} : vector<8x32xbf16> to vector<2x8xbf16>
    %c0_39 = arith.constant 0 : index
    %c0_40 = arith.constant 0 : index
    %c2_41 = arith.constant 2 : index
    %c0_42 = arith.constant 0 : index
    %39 = vector.load %arg15[%c0_39, %c0_40, %c2_41, %c0_42] : memref<1x4x8x8xbf16, #tpu.memory_space<vmem>>, vector<1x1x2x8xbf16>
    %40 = vector.shape_cast %39 : vector<1x1x2x8xbf16> to vector<2x8xbf16>
    %41 = vector.shape_cast %38 : vector<2x8xbf16> to vector<1x1x2x8xbf16>
    tpu.vector_store %arg15[%c0_39, %c0_40, %c2_41, %c0_42], %41 {strides = array<i32>} : memref<1x4x8x8xbf16, #tpu.memory_space<vmem>>, vector<1x1x2x8xbf16>,
    %42 = vector.extract_strided_slice %21 {offsets = [0, 8], sizes = [2, 8], strides = [1, 1]} : vector<8x32xbf16> to vector<2x8xbf16>
    %c0_43 = arith.constant 0 : index
    %c0_44 = arith.constant 0 : index
    %c2_45 = arith.constant 2 : index
    %c0_46 = arith.constant 0 : index
    %43 = vector.load %arg16[%c0_43, %c0_44, %c2_45, %c0_46] : memref<1x4x8x8xbf16, #tpu.memory_space<vmem>>, vector<1x1x2x8xbf16>
    %44 = vector.shape_cast %43 : vector<1x1x2x8xbf16> to vector<2x8xbf16>
    %45 = vector.shape_cast %42 : vector<2x8xbf16> to vector<1x1x2x8xbf16>
    tpu.vector_store %arg16[%c0_43, %c0_44, %c2_45, %c0_46], %45 {strides = array<i32>} : memref<1x4x8x8xbf16, #tpu.memory_space<vmem>>, vector<1x1x2x8xbf16>,
    %46 = vector.extract_strided_slice %9 {offsets = [0, 16], sizes = [2, 8], strides = [1, 1]} : vector<8x32xbf16> to vector<2x8xbf16>
    %c0_47 = arith.constant 0 : index
    %c0_48 = arith.constant 0 : index
    %c4 = arith.constant 4 : index
    %c0_49 = arith.constant 0 : index
    %47 = vector.load %arg14[%c0_47, %c0_48, %c4, %c0_49] : memref<1x4x8x8xbf16, #tpu.memory_space<vmem>>, vector<1x1x2x8xbf16>
    %48 = vector.shape_cast %47 : vector<1x1x2x8xbf16> to vector<2x8xbf16>
    %49 = vector.shape_cast %46 : vector<2x8xbf16> to vector<1x1x2x8xbf16>
    tpu.vector_store %arg14[%c0_47, %c0_48, %c4, %c0_49], %49 {strides = array<i32>} : memref<1x4x8x8xbf16, #tpu.memory_space<vmem>>, vector<1x1x2x8xbf16>,
    %50 = vector.extract_strided_slice %15 {offsets = [0, 16], sizes = [2, 8], strides = [1, 1]} : vector<8x32xbf16> to vector<2x8xbf16>
    %c0_50 = arith.constant 0 : index
    %c0_51 = arith.constant 0 : index
    %c4_52 = arith.constant 4 : index
    %c0_53 = arith.constant 0 : index
    %51 = vector.load %arg15[%c0_50, %c0_51, %c4_52, %c0_53] : memref<1x4x8x8xbf16, #tpu.memory_space<vmem>>, vector<1x1x2x8xbf16>
    %52 = vector.shape_cast %51 : vector<1x1x2x8xbf16> to vector<2x8xbf16>
    %53 = vector.shape_cast %50 : vector<2x8xbf16> to vector<1x1x2x8xbf16>
    tpu.vector_store %arg15[%c0_50, %c0_51, %c4_52, %c0_53], %53 {strides = array<i32>} : memref<1x4x8x8xbf16, #tpu.memory_space<vmem>>, vector<1x1x2x8xbf16>,
    %54 = vector.extract_strided_slice %21 {offsets = [0, 16], sizes = [2, 8], strides = [1, 1]} : vector<8x32xbf16> to vector<2x8xbf16>
    %c0_54 = arith.constant 0 : index
    %c0_55 = arith.constant 0 : index
    %c4_56 = arith.constant 4 : index
    %c0_57 = arith.constant 0 : index
    %55 = vector.load %arg16[%c0_54, %c0_55, %c4_56, %c0_57] : memref<1x4x8x8xbf16, #tpu.memory_space<vmem>>, vector<1x1x2x8xbf16>
    %56 = vector.shape_cast %55 : vector<1x1x2x8xbf16> to vector<2x8xbf16>
    %57 = vector.shape_cast %54 : vector<2x8xbf16> to vector<1x1x2x8xbf16>
    tpu.vector_store %arg16[%c0_54, %c0_55, %c4_56, %c0_57], %57 {strides = array<i32>} : memref<1x4x8x8xbf16, #tpu.memory_space<vmem>>, vector<1x1x2x8xbf16>,
    %58 = vector.extract_strided_slice %9 {offsets = [0, 24], sizes = [2, 8], strides = [1, 1]} : vector<8x32xbf16> to vector<2x8xbf16>
    %c0_58 = arith.constant 0 : index
    %c0_59 = arith.constant 0 : index
    %c6 = arith.constant 6 : index
    %c0_60 = arith.constant 0 : index
    %59 = vector.load %arg14[%c0_58, %c0_59, %c6, %c0_60] : memref<1x4x8x8xbf16, #tpu.memory_space<vmem>>, vector<1x1x2x8xbf16>
    %60 = vector.shape_cast %59 : vector<1x1x2x8xbf16> to vector<2x8xbf16>
    %61 = vector.shape_cast %58 : vector<2x8xbf16> to vector<1x1x2x8xbf16>
    tpu.vector_store %arg14[%c0_58, %c0_59, %c6, %c0_60], %61 {strides = array<i32>} : memref<1x4x8x8xbf16, #tpu.memory_space<vmem>>, vector<1x1x2x8xbf16>,
    %62 = vector.extract_strided_slice %15 {offsets = [0, 24], sizes = [2, 8], strides = [1, 1]} : vector<8x32xbf16> to vector<2x8xbf16>
    %c0_61 = arith.constant 0 : index
    %c0_62 = arith.constant 0 : index
    %c6_63 = arith.constant 6 : index
    %c0_64 = arith.constant 0 : index
    %63 = vector.load %arg15[%c0_61, %c0_62, %c6_63, %c0_64] : memref<1x4x8x8xbf16, #tpu.memory_space<vmem>>, vector<1x1x2x8xbf16>
    %64 = vector.shape_cast %63 : vector<1x1x2x8xbf16> to vector<2x8xbf16>
    %65 = vector.shape_cast %62 : vector<2x8xbf16> to vector<1x1x2x8xbf16>
    tpu.vector_store %arg15[%c0_61, %c0_62, %c6_63, %c0_64], %65 {strides = array<i32>} : memref<1x4x8x8xbf16, #tpu.memory_space<vmem>>, vector<1x1x2x8xbf16>,
    %66 = vector.extract_strided_slice %21 {offsets = [0, 24], sizes = [2, 8], strides = [1, 1]} : vector<8x32xbf16> to vector<2x8xbf16>
    %c0_65 = arith.constant 0 : index
    %c0_66 = arith.constant 0 : index
    %c6_67 = arith.constant 6 : index
    %c0_68 = arith.constant 0 : index
    %67 = vector.load %arg16[%c0_65, %c0_66, %c6_67, %c0_68] : memref<1x4x8x8xbf16, #tpu.memory_space<vmem>>, vector<1x1x2x8xbf16>
    %68 = vector.shape_cast %67 : vector<1x1x2x8xbf16> to vector<2x8xbf16>
    %69 = vector.shape_cast %66 : vector<2x8xbf16> to vector<1x1x2x8xbf16>
    tpu.vector_store %arg16[%c0_65, %c0_66, %c6_67, %c0_68], %69 {strides = array<i32>} : memref<1x4x8x8xbf16, #tpu.memory_space<vmem>>, vector<1x1x2x8xbf16>,
    %70 = vector.extract_strided_slice %9 {offsets = [2, 0], sizes = [2, 8], strides = [1, 1]} : vector<8x32xbf16> to vector<2x8xbf16>
    %c0_69 = arith.constant 0 : index
    %c1 = arith.constant 1 : index
    %c0_70 = arith.constant 0 : index
    %c0_71 = arith.constant 0 : index
    %71 = vector.load %arg14[%c0_69, %c1, %c0_70, %c0_71] : memref<1x4x8x8xbf16, #tpu.memory_space<vmem>>, vector<1x1x2x8xbf16>
    %72 = vector.shape_cast %71 : vector<1x1x2x8xbf16> to vector<2x8xbf16>
    %73 = vector.shape_cast %70 : vector<2x8xbf16> to vector<1x1x2x8xbf16>
    tpu.vector_store %arg14[%c0_69, %c1, %c0_70, %c0_71], %73 {strides = array<i32>} : memref<1x4x8x8xbf16, #tpu.memory_space<vmem>>, vector<1x1x2x8xbf16>,
    %74 = vector.extract_strided_slice %15 {offsets = [2, 0], sizes = [2, 8], strides = [1, 1]} : vector<8x32xbf16> to vector<2x8xbf16>
    %c0_72 = arith.constant 0 : index
    %c1_73 = arith.constant 1 : index
    %c0_74 = arith.constant 0 : index
    %c0_75 = arith.constant 0 : index
    %75 = vector.load %arg15[%c0_72, %c1_73, %c0_74, %c0_75] : memref<1x4x8x8xbf16, #tpu.memory_space<vmem>>, vector<1x1x2x8xbf16>
    %76 = vector.shape_cast %75 : vector<1x1x2x8xbf16> to vector<2x8xbf16>
    %77 = vector.shape_cast %74 : vector<2x8xbf16> to vector<1x1x2x8xbf16>
    tpu.vector_store %arg15[%c0_72, %c1_73, %c0_74, %c0_75], %77 {strides = array<i32>} : memref<1x4x8x8xbf16, #tpu.memory_space<vmem>>, vector<1x1x2x8xbf16>,
    %78 = vector.extract_strided_slice %21 {offsets = [2, 0], sizes = [2, 8], strides = [1, 1]} : vector<8x32xbf16> to vector<2x8xbf16>
    %c0_76 = arith.constant 0 : index
    %c1_77 = arith.constant 1 : index
    %c0_78 = arith.constant 0 : index
    %c0_79 = arith.constant 0 : index
    %79 = vector.load %arg16[%c0_76, %c1_77, %c0_78, %c0_79] : memref<1x4x8x8xbf16, #tpu.memory_space<vmem>>, vector<1x1x2x8xbf16>
    %80 = vector.shape_cast %79 : vector<1x1x2x8xbf16> to vector<2x8xbf16>
    %81 = vector.shape_cast %78 : vector<2x8xbf16> to vector<1x1x2x8xbf16>
    tpu.vector_store %arg16[%c0_76, %c1_77, %c0_78, %c0_79], %81 {strides = array<i32>} : memref<1x4x8x8xbf16, #tpu.memory_space<vmem>>, vector<1x1x2x8xbf16>,
    %82 = vector.extract_strided_slice %9 {offsets = [2, 8], sizes = [2, 8], strides = [1, 1]} : vector<8x32xbf16> to vector<2x8xbf16>
    %c0_80 = arith.constant 0 : index
    %c1_81 = arith.constant 1 : index
    %c2_82 = arith.constant 2 : index
    %c0_83 = arith.constant 0 : index
    %83 = vector.load %arg14[%c0_80, %c1_81, %c2_82, %c0_83] : memref<1x4x8x8xbf16, #tpu.memory_space<vmem>>, vector<1x1x2x8xbf16>
    %84 = vector.shape_cast %83 : vector<1x1x2x8xbf16> to vector<2x8xbf16>
    %85 = vector.shape_cast %82 : vector<2x8xbf16> to vector<1x1x2x8xbf16>
    tpu.vector_store %arg14[%c0_80, %c1_81, %c2_82, %c0_83], %85 {strides = array<i32>} : memref<1x4x8x8xbf16, #tpu.memory_space<vmem>>, vector<1x1x2x8xbf16>,
    %86 = vector.extract_strided_slice %15 {offsets = [2, 8], sizes = [2, 8], strides = [1, 1]} : vector<8x32xbf16> to vector<2x8xbf16>
    %c0_84 = arith.constant 0 : index
    %c1_85 = arith.constant 1 : index
    %c2_86 = arith.constant 2 : index
    %c0_87 = arith.constant 0 : index
    %87 = vector.load %arg15[%c0_84, %c1_85, %c2_86, %c0_87] : memref<1x4x8x8xbf16, #tpu.memory_space<vmem>>, vector<1x1x2x8xbf16>
    %88 = vector.shape_cast %87 : vector<1x1x2x8xbf16> to vector<2x8xbf16>
    %89 = vector.shape_cast %86 : vector<2x8xbf16> to vector<1x1x2x8xbf16>
    tpu.vector_store %arg15[%c0_84, %c1_85, %c2_86, %c0_87], %89 {strides = array<i32>} : memref<1x4x8x8xbf16, #tpu.memory_space<vmem>>, vector<1x1x2x8xbf16>,
    %90 = vector.extract_strided_slice %21 {offsets = [2, 8], sizes = [2, 8], strides = [1, 1]} : vector<8x32xbf16> to vector<2x8xbf16>
    %c0_88 = arith.constant 0 : index
    %c1_89 = arith.constant 1 : index
    %c2_90 = arith.constant 2 : index
    %c0_91 = arith.constant 0 : index
    %91 = vector.load %arg16[%c0_88, %c1_89, %c2_90, %c0_91] : memref<1x4x8x8xbf16, #tpu.memory_space<vmem>>, vector<1x1x2x8xbf16>
    %92 = vector.shape_cast %91 : vector<1x1x2x8xbf16> to vector<2x8xbf16>
    %93 = vector.shape_cast %90 : vector<2x8xbf16> to vector<1x1x2x8xbf16>
    tpu.vector_store %arg16[%c0_88, %c1_89, %c2_90, %c0_91], %93 {strides = array<i32>} : memref<1x4x8x8xbf16, #tpu.memory_space<vmem>>, vector<1x1x2x8xbf16>,
    %94 = vector.extract_strided_slice %9 {offsets = [2, 16], sizes = [2, 8], strides = [1, 1]} : vector<8x32xbf16> to vector<2x8xbf16>
    %c0_92 = arith.constant 0 : index
    %c1_93 = arith.constant 1 : index
    %c4_94 = arith.constant 4 : index
    %c0_95 = arith.constant 0 : index
    %95 = vector.load %arg14[%c0_92, %c1_93, %c4_94, %c0_95] : memref<1x4x8x8xbf16, #tpu.memory_space<vmem>>, vector<1x1x2x8xbf16>
    %96 = vector.shape_cast %95 : vector<1x1x2x8xbf16> to vector<2x8xbf16>
    %97 = vector.shape_cast %94 : vector<2x8xbf16> to vector<1x1x2x8xbf16>
    tpu.vector_store %arg14[%c0_92, %c1_93, %c4_94, %c0_95], %97 {strides = array<i32>} : memref<1x4x8x8xbf16, #tpu.memory_space<vmem>>, vector<1x1x2x8xbf16>,
    %98 = vector.extract_strided_slice %15 {offsets = [2, 16], sizes = [2, 8], strides = [1, 1]} : vector<8x32xbf16> to vector<2x8xbf16>
    %c0_96 = arith.constant 0 : index
    %c1_97 = arith.constant 1 : index
    %c4_98 = arith.constant 4 : index
    %c0_99 = arith.constant 0 : index
    %99 = vector.load %arg15[%c0_96, %c1_97, %c4_98, %c0_99] : memref<1x4x8x8xbf16, #tpu.memory_space<vmem>>, vector<1x1x2x8xbf16>
    %100 = vector.shape_cast %99 : vector<1x1x2x8xbf16> to vector<2x8xbf16>
    %101 = vector.shape_cast %98 : vector<2x8xbf16> to vector<1x1x2x8xbf16>
    tpu.vector_store %arg15[%c0_96, %c1_97, %c4_98, %c0_99], %101 {strides = array<i32>} : memref<1x4x8x8xbf16, #tpu.memory_space<vmem>>, vector<1x1x2x8xbf16>,
    %102 = vector.extract_strided_slice %21 {offsets = [2, 16], sizes = [2, 8], strides = [1, 1]} : vector<8x32xbf16> to vector<2x8xbf16>
    %c0_100 = arith.constant 0 : index
    %c1_101 = arith.constant 1 : index
    %c4_102 = arith.constant 4 : index
    %c0_103 = arith.constant 0 : index
    %103 = vector.load %arg16[%c0_100, %c1_101, %c4_102, %c0_103] : memref<1x4x8x8xbf16, #tpu.memory_space<vmem>>, vector<1x1x2x8xbf16>
    %104 = vector.shape_cast %103 : vector<1x1x2x8xbf16> to vector<2x8xbf16>
    %105 = vector.shape_cast %102 : vector<2x8xbf16> to vector<1x1x2x8xbf16>
    tpu.vector_store %arg16[%c0_100, %c1_101, %c4_102, %c0_103], %105 {strides = array<i32>} : memref<1x4x8x8xbf16, #tpu.memory_space<vmem>>, vector<1x1x2x8xbf16>,
    %106 = vector.extract_strided_slice %9 {offsets = [2, 24], sizes = [2, 8], strides = [1, 1]} : vector<8x32xbf16> to vector<2x8xbf16>
    %c0_104 = arith.constant 0 : index
    %c1_105 = arith.constant 1 : index
    %c6_106 = arith.constant 6 : index
    %c0_107 = arith.constant 0 : index
    %107 = vector.load %arg14[%c0_104, %c1_105, %c6_106, %c0_107] : memref<1x4x8x8xbf16, #tpu.memory_space<vmem>>, vector<1x1x2x8xbf16>
    %108 = vector.shape_cast %107 : vector<1x1x2x8xbf16> to vector<2x8xbf16>
    %109 = vector.shape_cast %106 : vector<2x8xbf16> to vector<1x1x2x8xbf16>
    tpu.vector_store %arg14[%c0_104, %c1_105, %c6_106, %c0_107], %109 {strides = array<i32>} : memref<1x4x8x8xbf16, #tpu.memory_space<vmem>>, vector<1x1x2x8xbf16>,
    %110 = vector.extract_strided_slice %15 {offsets = [2, 24], sizes = [2, 8], strides = [1, 1]} : vector<8x32xbf16> to vector<2x8xbf16>
    %c0_108 = arith.constant 0 : index
    %c1_109 = arith.constant 1 : index
    %c6_110 = arith.constant 6 : index
    %c0_111 = arith.constant 0 : index
    %111 = vector.load %arg15[%c0_108, %c1_109, %c6_110, %c0_111] : memref<1x4x8x8xbf16, #tpu.memory_space<vmem>>, vector<1x1x2x8xbf16>
    %112 = vector.shape_cast %111 : vector<1x1x2x8xbf16> to vector<2x8xbf16>
    %113 = vector.shape_cast %110 : vector<2x8xbf16> to vector<1x1x2x8xbf16>
    tpu.vector_store %arg15[%c0_108, %c1_109, %c6_110, %c0_111], %113 {strides = array<i32>} : memref<1x4x8x8xbf16, #tpu.memory_space<vmem>>, vector<1x1x2x8xbf16>,
    %114 = vector.extract_strided_slice %21 {offsets = [2, 24], sizes = [2, 8], strides = [1, 1]} : vector<8x32xbf16> to vector<2x8xbf16>
    %c0_112 = arith.constant 0 : index
    %c1_113 = arith.constant 1 : index
    %c6_114 = arith.constant 6 : index
    %c0_115 = arith.constant 0 : index
    %115 = vector.load %arg16[%c0_112, %c1_113, %c6_114, %c0_115] : memref<1x4x8x8xbf16, #tpu.memory_space<vmem>>, vector<1x1x2x8xbf16>
    %116 = vector.shape_cast %115 : vector<1x1x2x8xbf16> to vector<2x8xbf16>
    %117 = vector.shape_cast %114 : vector<2x8xbf16> to vector<1x1x2x8xbf16>
    tpu.vector_store %arg16[%c0_112, %c1_113, %c6_114, %c0_115], %117 {strides = array<i32>} : memref<1x4x8x8xbf16, #tpu.memory_space<vmem>>, vector<1x1x2x8xbf16>,
    %118 = vector.extract_strided_slice %9 {offsets = [4, 0], sizes = [2, 8], strides = [1, 1]} : vector<8x32xbf16> to vector<2x8xbf16>
    %c0_116 = arith.constant 0 : index
    %c2_117 = arith.constant 2 : index
    %c0_118 = arith.constant 0 : index
    %c0_119 = arith.constant 0 : index
    %119 = vector.load %arg14[%c0_116, %c2_117, %c0_118, %c0_119] : memref<1x4x8x8xbf16, #tpu.memory_space<vmem>>, vector<1x1x2x8xbf16>
    %120 = vector.shape_cast %119 : vector<1x1x2x8xbf16> to vector<2x8xbf16>
    %121 = vector.shape_cast %118 : vector<2x8xbf16> to vector<1x1x2x8xbf16>
    tpu.vector_store %arg14[%c0_116, %c2_117, %c0_118, %c0_119], %121 {strides = array<i32>} : memref<1x4x8x8xbf16, #tpu.memory_space<vmem>>, vector<1x1x2x8xbf16>,
    %122 = vector.extract_strided_slice %15 {offsets = [4, 0], sizes = [2, 8], strides = [1, 1]} : vector<8x32xbf16> to vector<2x8xbf16>
    %c0_120 = arith.constant 0 : index
    %c2_121 = arith.constant 2 : index
    %c0_122 = arith.constant 0 : index
    %c0_123 = arith.constant 0 : index
    %123 = vector.load %arg15[%c0_120, %c2_121, %c0_122, %c0_123] : memref<1x4x8x8xbf16, #tpu.memory_space<vmem>>, vector<1x1x2x8xbf16>
    %124 = vector.shape_cast %123 : vector<1x1x2x8xbf16> to vector<2x8xbf16>
    %125 = vector.shape_cast %122 : vector<2x8xbf16> to vector<1x1x2x8xbf16>
    tpu.vector_store %arg15[%c0_120, %c2_121, %c0_122, %c0_123], %125 {strides = array<i32>} : memref<1x4x8x8xbf16, #tpu.memory_space<vmem>>, vector<1x1x2x8xbf16>,
    %126 = vector.extract_strided_slice %21 {offsets = [4, 0], sizes = [2, 8], strides = [1, 1]} : vector<8x32xbf16> to vector<2x8xbf16>
    %c0_124 = arith.constant 0 : index
    %c2_125 = arith.constant 2 : index
    %c0_126 = arith.constant 0 : index
    %c0_127 = arith.constant 0 : index
    %127 = vector.load %arg16[%c0_124, %c2_125, %c0_126, %c0_127] : memref<1x4x8x8xbf16, #tpu.memory_space<vmem>>, vector<1x1x2x8xbf16>
    %128 = vector.shape_cast %127 : vector<1x1x2x8xbf16> to vector<2x8xbf16>
    %129 = vector.shape_cast %126 : vector<2x8xbf16> to vector<1x1x2x8xbf16>
    tpu.vector_store %arg16[%c0_124, %c2_125, %c0_126, %c0_127], %129 {strides = array<i32>} : memref<1x4x8x8xbf16, #tpu.memory_space<vmem>>, vector<1x1x2x8xbf16>,
    %130 = vector.extract_strided_slice %9 {offsets = [4, 8], sizes = [2, 8], strides = [1, 1]} : vector<8x32xbf16> to vector<2x8xbf16>
    %c0_128 = arith.constant 0 : index
    %c2_129 = arith.constant 2 : index
    %c2_130 = arith.constant 2 : index
    %c0_131 = arith.constant 0 : index
    %131 = vector.load %arg14[%c0_128, %c2_129, %c2_130, %c0_131] : memref<1x4x8x8xbf16, #tpu.memory_space<vmem>>, vector<1x1x2x8xbf16>
    %132 = vector.shape_cast %131 : vector<1x1x2x8xbf16> to vector<2x8xbf16>
    %133 = vector.shape_cast %130 : vector<2x8xbf16> to vector<1x1x2x8xbf16>
    tpu.vector_store %arg14[%c0_128, %c2_129, %c2_130, %c0_131], %133 {strides = array<i32>} : memref<1x4x8x8xbf16, #tpu.memory_space<vmem>>, vector<1x1x2x8xbf16>,
    %134 = vector.extract_strided_slice %15 {offsets = [4, 8], sizes = [2, 8], strides = [1, 1]} : vector<8x32xbf16> to vector<2x8xbf16>
    %c0_132 = arith.constant 0 : index
    %c2_133 = arith.constant 2 : index
    %c2_134 = arith.constant 2 : index
    %c0_135 = arith.constant 0 : index
    %135 = vector.load %arg15[%c0_132, %c2_133, %c2_134, %c0_135] : memref<1x4x8x8xbf16, #tpu.memory_space<vmem>>, vector<1x1x2x8xbf16>
    %136 = vector.shape_cast %135 : vector<1x1x2x8xbf16> to vector<2x8xbf16>
    %137 = vector.shape_cast %134 : vector<2x8xbf16> to vector<1x1x2x8xbf16>
    tpu.vector_store %arg15[%c0_132, %c2_133, %c2_134, %c0_135], %137 {strides = array<i32>} : memref<1x4x8x8xbf16, #tpu.memory_space<vmem>>, vector<1x1x2x8xbf16>,
    %138 = vector.extract_strided_slice %21 {offsets = [4, 8], sizes = [2, 8], strides = [1, 1]} : vector<8x32xbf16> to vector<2x8xbf16>
    %c0_136 = arith.constant 0 : index
    %c2_137 = arith.constant 2 : index
    %c2_138 = arith.constant 2 : index
    %c0_139 = arith.constant 0 : index
    %139 = vector.load %arg16[%c0_136, %c2_137, %c2_138, %c0_139] : memref<1x4x8x8xbf16, #tpu.memory_space<vmem>>, vector<1x1x2x8xbf16>
    %140 = vector.shape_cast %139 : vector<1x1x2x8xbf16> to vector<2x8xbf16>
    %141 = vector.shape_cast %138 : vector<2x8xbf16> to vector<1x1x2x8xbf16>
    tpu.vector_store %arg16[%c0_136, %c2_137, %c2_138, %c0_139], %141 {strides = array<i32>} : memref<1x4x8x8xbf16, #tpu.memory_space<vmem>>, vector<1x1x2x8xbf16>,
    %142 = vector.extract_strided_slice %9 {offsets = [4, 16], sizes = [2, 8], strides = [1, 1]} : vector<8x32xbf16> to vector<2x8xbf16>
    %c0_140 = arith.constant 0 : index
    %c2_141 = arith.constant 2 : index
    %c4_142 = arith.constant 4 : index
    %c0_143 = arith.constant 0 : index
    %143 = vector.load %arg14[%c0_140, %c2_141, %c4_142, %c0_143] : memref<1x4x8x8xbf16, #tpu.memory_space<vmem>>, vector<1x1x2x8xbf16>
    %144 = vector.shape_cast %143 : vector<1x1x2x8xbf16> to vector<2x8xbf16>
    %145 = vector.shape_cast %142 : vector<2x8xbf16> to vector<1x1x2x8xbf16>
    tpu.vector_store %arg14[%c0_140, %c2_141, %c4_142, %c0_143], %145 {strides = array<i32>} : memref<1x4x8x8xbf16, #tpu.memory_space<vmem>>, vector<1x1x2x8xbf16>,
    %146 = vector.extract_strided_slice %15 {offsets = [4, 16], sizes = [2, 8], strides = [1, 1]} : vector<8x32xbf16> to vector<2x8xbf16>
    %c0_144 = arith.constant 0 : index
    %c2_145 = arith.constant 2 : index
    %c4_146 = arith.constant 4 : index
    %c0_147 = arith.constant 0 : index
    %147 = vector.load %arg15[%c0_144, %c2_145, %c4_146, %c0_147] : memref<1x4x8x8xbf16, #tpu.memory_space<vmem>>, vector<1x1x2x8xbf16>
    %148 = vector.shape_cast %147 : vector<1x1x2x8xbf16> to vector<2x8xbf16>
    %149 = vector.shape_cast %146 : vector<2x8xbf16> to vector<1x1x2x8xbf16>
    tpu.vector_store %arg15[%c0_144, %c2_145, %c4_146, %c0_147], %149 {strides = array<i32>} : memref<1x4x8x8xbf16, #tpu.memory_space<vmem>>, vector<1x1x2x8xbf16>,
    %150 = vector.extract_strided_slice %21 {offsets = [4, 16], sizes = [2, 8], strides = [1, 1]} : vector<8x32xbf16> to vector<2x8xbf16>
    %c0_148 = arith.constant 0 : index
    %c2_149 = arith.constant 2 : index
    %c4_150 = arith.constant 4 : index
    %c0_151 = arith.constant 0 : index
    %151 = vector.load %arg16[%c0_148, %c2_149, %c4_150, %c0_151] : memref<1x4x8x8xbf16, #tpu.memory_space<vmem>>, vector<1x1x2x8xbf16>
    %152 = vector.shape_cast %151 : vector<1x1x2x8xbf16> to vector<2x8xbf16>
    %153 = vector.shape_cast %150 : vector<2x8xbf16> to vector<1x1x2x8xbf16>
    tpu.vector_store %arg16[%c0_148, %c2_149, %c4_150, %c0_151], %153 {strides = array<i32>} : memref<1x4x8x8xbf16, #tpu.memory_space<vmem>>, vector<1x1x2x8xbf16>,
    %154 = vector.extract_strided_slice %9 {offsets = [4, 24], sizes = [2, 8], strides = [1, 1]} : vector<8x32xbf16> to vector<2x8xbf16>
    %c0_152 = arith.constant 0 : index
    %c2_153 = arith.constant 2 : index
    %c6_154 = arith.constant 6 : index
    %c0_155 = arith.constant 0 : index
    %155 = vector.load %arg14[%c0_152, %c2_153, %c6_154, %c0_155] : memref<1x4x8x8xbf16, #tpu.memory_space<vmem>>, vector<1x1x2x8xbf16>
    %156 = vector.shape_cast %155 : vector<1x1x2x8xbf16> to vector<2x8xbf16>
    %157 = vector.shape_cast %154 : vector<2x8xbf16> to vector<1x1x2x8xbf16>
    tpu.vector_store %arg14[%c0_152, %c2_153, %c6_154, %c0_155], %157 {strides = array<i32>} : memref<1x4x8x8xbf16, #tpu.memory_space<vmem>>, vector<1x1x2x8xbf16>,
    %158 = vector.extract_strided_slice %15 {offsets = [4, 24], sizes = [2, 8], strides = [1, 1]} : vector<8x32xbf16> to vector<2x8xbf16>
    %c0_156 = arith.constant 0 : index
    %c2_157 = arith.constant 2 : index
    %c6_158 = arith.constant 6 : index
    %c0_159 = arith.constant 0 : index
    %159 = vector.load %arg15[%c0_156, %c2_157, %c6_158, %c0_159] : memref<1x4x8x8xbf16, #tpu.memory_space<vmem>>, vector<1x1x2x8xbf16>
    %160 = vector.shape_cast %159 : vector<1x1x2x8xbf16> to vector<2x8xbf16>
    %161 = vector.shape_cast %158 : vector<2x8xbf16> to vector<1x1x2x8xbf16>
    tpu.vector_store %arg15[%c0_156, %c2_157, %c6_158, %c0_159], %161 {strides = array<i32>} : memref<1x4x8x8xbf16, #tpu.memory_space<vmem>>, vector<1x1x2x8xbf16>,
    %162 = vector.extract_strided_slice %21 {offsets = [4, 24], sizes = [2, 8], strides = [1, 1]} : vector<8x32xbf16> to vector<2x8xbf16>
    %c0_160 = arith.constant 0 : index
    %c2_161 = arith.constant 2 : index
    %c6_162 = arith.constant 6 : index
    %c0_163 = arith.constant 0 : index
    %163 = vector.load %arg16[%c0_160, %c2_161, %c6_162, %c0_163] : memref<1x4x8x8xbf16, #tpu.memory_space<vmem>>, vector<1x1x2x8xbf16>
    %164 = vector.shape_cast %163 : vector<1x1x2x8xbf16> to vector<2x8xbf16>
    %165 = vector.shape_cast %162 : vector<2x8xbf16> to vector<1x1x2x8xbf16>
    tpu.vector_store %arg16[%c0_160, %c2_161, %c6_162, %c0_163], %165 {strides = array<i32>} : memref<1x4x8x8xbf16, #tpu.memory_space<vmem>>, vector<1x1x2x8xbf16>,
    %166 = vector.extract_strided_slice %9 {offsets = [6, 0], sizes = [2, 8], strides = [1, 1]} : vector<8x32xbf16> to vector<2x8xbf16>
    %c0_164 = arith.constant 0 : index
    %c3 = arith.constant 3 : index
    %c0_165 = arith.constant 0 : index
    %c0_166 = arith.constant 0 : index
    %167 = vector.load %arg14[%c0_164, %c3, %c0_165, %c0_166] : memref<1x4x8x8xbf16, #tpu.memory_space<vmem>>, vector<1x1x2x8xbf16>
    %168 = vector.shape_cast %167 : vector<1x1x2x8xbf16> to vector<2x8xbf16>
    %169 = vector.shape_cast %166 : vector<2x8xbf16> to vector<1x1x2x8xbf16>
    tpu.vector_store %arg14[%c0_164, %c3, %c0_165, %c0_166], %169 {strides = array<i32>} : memref<1x4x8x8xbf16, #tpu.memory_space<vmem>>, vector<1x1x2x8xbf16>,
    %170 = vector.extract_strided_slice %15 {offsets = [6, 0], sizes = [2, 8], strides = [1, 1]} : vector<8x32xbf16> to vector<2x8xbf16>
    %c0_167 = arith.constant 0 : index
    %c3_168 = arith.constant 3 : index
    %c0_169 = arith.constant 0 : index
    %c0_170 = arith.constant 0 : index
    %171 = vector.load %arg15[%c0_167, %c3_168, %c0_169, %c0_170] : memref<1x4x8x8xbf16, #tpu.memory_space<vmem>>, vector<1x1x2x8xbf16>
    %172 = vector.shape_cast %171 : vector<1x1x2x8xbf16> to vector<2x8xbf16>
    %173 = vector.shape_cast %170 : vector<2x8xbf16> to vector<1x1x2x8xbf16>
    tpu.vector_store %arg15[%c0_167, %c3_168, %c0_169, %c0_170], %173 {strides = array<i32>} : memref<1x4x8x8xbf16, #tpu.memory_space<vmem>>, vector<1x1x2x8xbf16>,
    %174 = vector.extract_strided_slice %21 {offsets = [6, 0], sizes = [2, 8], strides = [1, 1]} : vector<8x32xbf16> to vector<2x8xbf16>
    %c0_171 = arith.constant 0 : index
    %c3_172 = arith.constant 3 : index
    %c0_173 = arith.constant 0 : index
    %c0_174 = arith.constant 0 : index
    %175 = vector.load %arg16[%c0_171, %c3_172, %c0_173, %c0_174] : memref<1x4x8x8xbf16, #tpu.memory_space<vmem>>, vector<1x1x2x8xbf16>
    %176 = vector.shape_cast %175 : vector<1x1x2x8xbf16> to vector<2x8xbf16>
    %177 = vector.shape_cast %174 : vector<2x8xbf16> to vector<1x1x2x8xbf16>
    tpu.vector_store %arg16[%c0_171, %c3_172, %c0_173, %c0_174], %177 {strides = array<i32>} : memref<1x4x8x8xbf16, #tpu.memory_space<vmem>>, vector<1x1x2x8xbf16>,
    %178 = vector.extract_strided_slice %9 {offsets = [6, 8], sizes = [2, 8], strides = [1, 1]} : vector<8x32xbf16> to vector<2x8xbf16>
    %c0_175 = arith.constant 0 : index
    %c3_176 = arith.constant 3 : index
    %c2_177 = arith.constant 2 : index
    %c0_178 = arith.constant 0 : index
    %179 = vector.load %arg14[%c0_175, %c3_176, %c2_177, %c0_178] : memref<1x4x8x8xbf16, #tpu.memory_space<vmem>>, vector<1x1x2x8xbf16>
    %180 = vector.shape_cast %179 : vector<1x1x2x8xbf16> to vector<2x8xbf16>
    %181 = vector.shape_cast %178 : vector<2x8xbf16> to vector<1x1x2x8xbf16>
    tpu.vector_store %arg14[%c0_175, %c3_176, %c2_177, %c0_178], %181 {strides = array<i32>} : memref<1x4x8x8xbf16, #tpu.memory_space<vmem>>, vector<1x1x2x8xbf16>,
    %182 = vector.extract_strided_slice %15 {offsets = [6, 8], sizes = [2, 8], strides = [1, 1]} : vector<8x32xbf16> to vector<2x8xbf16>
    %c0_179 = arith.constant 0 : index
    %c3_180 = arith.constant 3 : index
    %c2_181 = arith.constant 2 : index
    %c0_182 = arith.constant 0 : index
    %183 = vector.load %arg15[%c0_179, %c3_180, %c2_181, %c0_182] : memref<1x4x8x8xbf16, #tpu.memory_space<vmem>>, vector<1x1x2x8xbf16>
    %184 = vector.shape_cast %183 : vector<1x1x2x8xbf16> to vector<2x8xbf16>
    %185 = vector.shape_cast %182 : vector<2x8xbf16> to vector<1x1x2x8xbf16>
    tpu.vector_store %arg15[%c0_179, %c3_180, %c2_181, %c0_182], %185 {strides = array<i32>} : memref<1x4x8x8xbf16, #tpu.memory_space<vmem>>, vector<1x1x2x8xbf16>,
    %186 = vector.extract_strided_slice %21 {offsets = [6, 8], sizes = [2, 8], strides = [1, 1]} : vector<8x32xbf16> to vector<2x8xbf16>
    %c0_183 = arith.constant 0 : index
    %c3_184 = arith.constant 3 : index
    %c2_185 = arith.constant 2 : index
    %c0_186 = arith.constant 0 : index
    %187 = vector.load %arg16[%c0_183, %c3_184, %c2_185, %c0_186] : memref<1x4x8x8xbf16, #tpu.memory_space<vmem>>, vector<1x1x2x8xbf16>
    %188 = vector.shape_cast %187 : vector<1x1x2x8xbf16> to vector<2x8xbf16>
    %189 = vector.shape_cast %186 : vector<2x8xbf16> to vector<1x1x2x8xbf16>
    tpu.vector_store %arg16[%c0_183, %c3_184, %c2_185, %c0_186], %189 {strides = array<i32>} : memref<1x4x8x8xbf16, #tpu.memory_space<vmem>>, vector<1x1x2x8xbf16>,
    %190 = vector.extract_strided_slice %9 {offsets = [6, 16], sizes = [2, 8], strides = [1, 1]} : vector<8x32xbf16> to vector<2x8xbf16>
    %c0_187 = arith.constant 0 : index
    %c3_188 = arith.constant 3 : index
    %c4_189 = arith.constant 4 : index
    %c0_190 = arith.constant 0 : index
    %191 = vector.load %arg14[%c0_187, %c3_188, %c4_189, %c0_190] : memref<1x4x8x8xbf16, #tpu.memory_space<vmem>>, vector<1x1x2x8xbf16>
    %192 = vector.shape_cast %191 : vector<1x1x2x8xbf16> to vector<2x8xbf16>
    %193 = vector.shape_cast %190 : vector<2x8xbf16> to vector<1x1x2x8xbf16>
    tpu.vector_store %arg14[%c0_187, %c3_188, %c4_189, %c0_190], %193 {strides = array<i32>} : memref<1x4x8x8xbf16, #tpu.memory_space<vmem>>, vector<1x1x2x8xbf16>,
    %194 = vector.extract_strided_slice %15 {offsets = [6, 16], sizes = [2, 8], strides = [1, 1]} : vector<8x32xbf16> to vector<2x8xbf16>
    %c0_191 = arith.constant 0 : index
    %c3_192 = arith.constant 3 : index
    %c4_193 = arith.constant 4 : index
    %c0_194 = arith.constant 0 : index
    %195 = vector.load %arg15[%c0_191, %c3_192, %c4_193, %c0_194] : memref<1x4x8x8xbf16, #tpu.memory_space<vmem>>, vector<1x1x2x8xbf16>
    %196 = vector.shape_cast %195 : vector<1x1x2x8xbf16> to vector<2x8xbf16>
    %197 = vector.shape_cast %194 : vector<2x8xbf16> to vector<1x1x2x8xbf16>
    tpu.vector_store %arg15[%c0_191, %c3_192, %c4_193, %c0_194], %197 {strides = array<i32>} : memref<1x4x8x8xbf16, #tpu.memory_space<vmem>>, vector<1x1x2x8xbf16>,
    %198 = vector.extract_strided_slice %21 {offsets = [6, 16], sizes = [2, 8], strides = [1, 1]} : vector<8x32xbf16> to vector<2x8xbf16>
    %c0_195 = arith.constant 0 : index
    %c3_196 = arith.constant 3 : index
    %c4_197 = arith.constant 4 : index
    %c0_198 = arith.constant 0 : index
    %199 = vector.load %arg16[%c0_195, %c3_196, %c4_197, %c0_198] : memref<1x4x8x8xbf16, #tpu.memory_space<vmem>>, vector<1x1x2x8xbf16>
    %200 = vector.shape_cast %199 : vector<1x1x2x8xbf16> to vector<2x8xbf16>
    %201 = vector.shape_cast %198 : vector<2x8xbf16> to vector<1x1x2x8xbf16>
    tpu.vector_store %arg16[%c0_195, %c3_196, %c4_197, %c0_198], %201 {strides = array<i32>} : memref<1x4x8x8xbf16, #tpu.memory_space<vmem>>, vector<1x1x2x8xbf16>,
    %202 = vector.extract_strided_slice %9 {offsets = [6, 24], sizes = [2, 8], strides = [1, 1]} : vector<8x32xbf16> to vector<2x8xbf16>
    %c0_199 = arith.constant 0 : index
    %c3_200 = arith.constant 3 : index
    %c6_201 = arith.constant 6 : index
    %c0_202 = arith.constant 0 : index
    %203 = vector.load %arg14[%c0_199, %c3_200, %c6_201, %c0_202] : memref<1x4x8x8xbf16, #tpu.memory_space<vmem>>, vector<1x1x2x8xbf16>
    %204 = vector.shape_cast %203 : vector<1x1x2x8xbf16> to vector<2x8xbf16>
    %205 = vector.shape_cast %202 : vector<2x8xbf16> to vector<1x1x2x8xbf16>
    tpu.vector_store %arg14[%c0_199, %c3_200, %c6_201, %c0_202], %205 {strides = array<i32>} : memref<1x4x8x8xbf16, #tpu.memory_space<vmem>>, vector<1x1x2x8xbf16>,
    %206 = vector.extract_strided_slice %15 {offsets = [6, 24], sizes = [2, 8], strides = [1, 1]} : vector<8x32xbf16> to vector<2x8xbf16>
    %c0_203 = arith.constant 0 : index
    %c3_204 = arith.constant 3 : index
    %c6_205 = arith.constant 6 : index
    %c0_206 = arith.constant 0 : index
    %207 = vector.load %arg15[%c0_203, %c3_204, %c6_205, %c0_206] : memref<1x4x8x8xbf16, #tpu.memory_space<vmem>>, vector<1x1x2x8xbf16>
    %208 = vector.shape_cast %207 : vector<1x1x2x8xbf16> to vector<2x8xbf16>
    %209 = vector.shape_cast %206 : vector<2x8xbf16> to vector<1x1x2x8xbf16>
    tpu.vector_store %arg15[%c0_203, %c3_204, %c6_205, %c0_206], %209 {strides = array<i32>} : memref<1x4x8x8xbf16, #tpu.memory_space<vmem>>, vector<1x1x2x8xbf16>,
    %210 = vector.extract_strided_slice %21 {offsets = [6, 24], sizes = [2, 8], strides = [1, 1]} : vector<8x32xbf16> to vector<2x8xbf16>
    %c0_207 = arith.constant 0 : index
    %c3_208 = arith.constant 3 : index
    %c6_209 = arith.constant 6 : index
    %c0_210 = arith.constant 0 : index
    %211 = vector.load %arg16[%c0_207, %c3_208, %c6_209, %c0_210] : memref<1x4x8x8xbf16, #tpu.memory_space<vmem>>, vector<1x1x2x8xbf16>
    %212 = vector.shape_cast %211 : vector<1x1x2x8xbf16> to vector<2x8xbf16>
    %213 = vector.shape_cast %210 : vector<2x8xbf16> to vector<1x1x2x8xbf16>
    tpu.vector_store %arg16[%c0_207, %c3_208, %c6_209, %c0_210], %213 {strides = array<i32>} : memref<1x4x8x8xbf16, #tpu.memory_space<vmem>>, vector<1x1x2x8xbf16>,
    %c0_211 = arith.constant 0 : index
    %c0_212 = arith.constant 0 : index
    %c0_213 = arith.constant 0 : index
    %c0_214 = arith.constant 0 : index
    %214 = vector.load %arg14[%c0_211, %c0_212, %c0_213, %c0_214] : memref<1x4x8x8xbf16, #tpu.memory_space<vmem>>, vector<1x4x8x8xbf16>
    %215 = vector.shape_cast %214 : vector<1x4x8x8xbf16> to vector<4x8x8xbf16>
    %c0_215 = arith.constant 0 : index
    %c0_216 = arith.constant 0 : index
    %c0_217 = arith.constant 0 : index
    %c0_218 = arith.constant 0 : index
    %216 = vector.load %arg15[%c0_215, %c0_216, %c0_217, %c0_218] : memref<1x4x8x8xbf16, #tpu.memory_space<vmem>>, vector<1x4x8x8xbf16>
    %217 = vector.shape_cast %216 : vector<1x4x8x8xbf16> to vector<4x8x8xbf16>
    %c0_219 = arith.constant 0 : index
    %c0_220 = arith.constant 0 : index
    %c0_221 = arith.constant 0 : index
    %c0_222 = arith.constant 0 : index
    %218 = vector.load %arg16[%c0_219, %c0_220, %c0_221, %c0_222] : memref<1x4x8x8xbf16, #tpu.memory_space<vmem>>, vector<1x4x8x8xbf16>
    %219 = vector.shape_cast %218 : vector<1x4x8x8xbf16> to vector<4x8x8xbf16>
    "tpu.trace_start"() <{level = 10 : i32, message = "hqd,hkd->hqk"}> : () -> ()
    %cst_223 = arith.constant dense<0.000000e+00> : vector<4x8x8xf32>
    %220 = tpu.matmul %215, %217, %cst_223 {dimension_numbers = #tpu.dot_dimension_numbers<[2], [2], [1], [1], [0, 0, 0, 1, 1, 1], [0], [0]>} : vector<4x8x8xbf16>, vector<4x8x8xbf16>, vector<4x8x8xf32> -> vector<4x8x8xf32>
    "tpu.trace_stop"() : () -> ()
    %cst_224 = arith.constant dense<0xFF800000> : vector<4x8xf32>
    %221 = vector.multi_reduction <maximumf>, %220, %cst_224 [2] : vector<4x8x8xf32> to vector<4x8xf32>
    %222 = vector.shape_cast %221 : vector<4x8xf32> to vector<4x8x1xf32>
    %223 = vector.broadcast %222 : vector<4x8x1xf32> to vector<4x8x8xf32>
    %224 = arith.subf %220, %223 : vector<4x8x8xf32>
    %225 = math.exp %224 : vector<4x8x8xf32>
    %cst_225 = arith.constant dense<0.000000e+00> : vector<4x8xf32>
    %226 = vector.multi_reduction <add>, %225, %cst_225 [2] : vector<4x8x8xf32> to vector<4x8xf32>
    %227 = vector.shape_cast %226 : vector<4x8xf32> to vector<4x8x1xf32>
    %228 = vector.broadcast %227 : vector<4x8x1xf32> to vector<4x8x8xf32>
    %229 = arith.divf %225, %228 : vector<4x8x8xf32>
    %230 = arith.truncf %229 : vector<4x8x8xf32> to vector<4x8x8xbf16>
    "tpu.trace_start"() <{level = 10 : i32, message = "hqk,hkd->hqd"}> : () -> ()
    %cst_226 = arith.constant dense<0.000000e+00> : vector<4x8x8xf32>
    %231 = tpu.matmul %230, %219, %cst_226 {dimension_numbers = #tpu.dot_dimension_numbers<[2], [1], [1], [2], [0, 0, 0, 1, 1, 2], [0], [0]>} : vector<4x8x8xbf16>, vector<4x8x8xbf16>, vector<4x8x8xf32> -> vector<4x8x8xf32>
    "tpu.trace_stop"() : () -> ()
    %cst_227 = arith.constant dense<0.000000e+00> : vector<8x8xf32>
    %232 = vector.multi_reduction <add>, %229, %cst_227 [0] : vector<4x8x8xf32> to vector<8x8xf32>
    %cst_228 = arith.constant dense<0.000000e+00> : vector<8x8xf32>
    %233 = tpu.matmul %232, %0, %cst_228 {dimension_numbers = #tpu.dot_dimension_numbers<[1], [0], [0], [1], [0, 0, 1, 1], [], []>} : vector<8x8xf32>, vector<8x8xf32>, vector<8x8xf32> -> vector<8x8xf32>
    %cst_229 = arith.constant dense<0.000000e+00> : vector<8x8xf32>
    %234 = tpu.matmul %1, %233, %cst_229 {dimension_numbers = #tpu.dot_dimension_numbers<[1], [0], [0], [1], [0, 0, 1, 1], [], []>} : vector<8x8xf32>, vector<8x8xf32>, vector<8x8xf32> -> vector<8x8xf32>
    %235 = tpu.transpose %234, [1, 0] : vector<8x8xf32> -> vector<8x8xf32>
    %cst_230 = arith.constant 2.500000e-01 : f32
    %236 = vector.broadcast %cst_230 : f32 to vector<8x8xf32>
    %237 = arith.mulf %235, %236 : vector<8x8xf32>
    %c0_231 = arith.constant 0 : index
    %c0_232 = arith.constant 0 : index
    %c0_233 = arith.constant 0 : index
    %238 = vector.load %arg13[%c0_231, %c0_232, %c0_233] : memref<1x8x8xf32, #tpu.memory_space<vmem>>, vector<1x8x8xf32>
    %239 = vector.shape_cast %238 : vector<1x8x8xf32> to vector<8x8xf32>
    %240 = vector.shape_cast %237 : vector<8x8xf32> to vector<1x8x8xf32>
    tpu.vector_store %arg13[%c0_231, %c0_232, %c0_233], %240 {strides = array<i32>} : memref<1x8x8xf32, #tpu.memory_space<vmem>>, vector<1x8x8xf32>,
    %241 = arith.truncf %231 : vector<4x8x8xf32> to vector<4x8x8xbf16>
    %c0_234 = arith.constant 0 : index
    %c0_235 = arith.constant 0 : index
    %c0_236 = arith.constant 0 : index
    %242 = vector.load %arg7[%c0_234, %c0_235, %c0_236] : memref<4x8x32xbf16, #tpu.memory_space<vmem>>, vector<4x8x32xbf16>
    "tpu.trace_start"() <{level = 10 : i32, message = "hqd,hdf->hqf"}> : () -> ()
    %cst_237 = arith.constant dense<0.000000e+00> : vector<4x8x32xf32>
    %243 = tpu.matmul %241, %242, %cst_237 {dimension_numbers = #tpu.dot_dimension_numbers<[2], [1], [1], [2], [0, 0, 0, 1, 1, 2], [0], [0]>} : vector<4x8x8xbf16>, vector<4x8x32xbf16>, vector<4x8x32xf32> -> vector<4x8x32xf32>
    "tpu.trace_stop"() : () -> ()
    %cst_238 = arith.constant dense<0.000000e+00> : vector<8x32xf32>
    %244 = vector.multi_reduction <add>, %243, %cst_238 [0] : vector<4x8x32xf32> to vector<8x32xf32>
    %cst_239 = arith.constant dense<0.000000e+00> : vector<8x32xf32>
    %245 = tpu.matmul %1, %244, %cst_239 {dimension_numbers = #tpu.dot_dimension_numbers<[1], [0], [0], [1], [0, 0, 1, 1], [], []>} : vector<8x8xf32>, vector<8x32xf32>, vector<8x32xf32> -> vector<8x32xf32>
    %246 = arith.addf %245, %5 : vector<8x32xf32>
    %cst_240 = arith.constant dense<0.000000e+00> : vector<8xf32>
    %247 = vector.multi_reduction <add>, %246, %cst_240 [1] : vector<8x32xf32> to vector<8xf32>
    %248 = vector.shape_cast %247 : vector<8xf32> to vector<8x1xf32>
    %cst_241 = arith.constant 3.200000e+01 : f32
    %249 = vector.broadcast %cst_241 : f32 to vector<8x1xf32>
    %250 = arith.divf %248, %249 : vector<8x1xf32>
    %251 = vector.broadcast %250 : vector<8x1xf32> to vector<8x32xf32>
    %252 = arith.subf %246, %251 : vector<8x32xf32>
    %253 = arith.mulf %252, %252 : vector<8x32xf32>
    %cst_242 = arith.constant dense<0.000000e+00> : vector<8xf32>
    %254 = vector.multi_reduction <add>, %253, %cst_242 [1] : vector<8x32xf32> to vector<8xf32>
    %255 = vector.shape_cast %254 : vector<8xf32> to vector<8x1xf32>
    %cst_243 = arith.constant 3.200000e+01 : f32
    %256 = vector.broadcast %cst_243 : f32 to vector<8x1xf32>
    %257 = arith.divf %255, %256 : vector<8x1xf32>
    %cst_244 = arith.constant 9.99999974E-6 : f32
    %258 = vector.broadcast %cst_244 : f32 to vector<8x1xf32>
    %259 = arith.addf %257, %258 : vector<8x1xf32>
    %260 = math.rsqrt %259 : vector<8x1xf32>
    %261 = vector.broadcast %260 : vector<8x1xf32> to vector<8x32xf32>
    %262 = arith.mulf %252, %261 : vector<8x32xf32>
    %263 = vector.broadcast %2 : vector<1x32xf32> to vector<8x32xf32>
    %264 = arith.mulf %262, %263 : vector<8x32xf32>
    %265 = vector.broadcast %3 : vector<1x32xf32> to vector<8x32xf32>
    %266 = arith.addf %264, %265 : vector<8x32xf32>
    %c0_245 = arith.constant 0 : index
    %c0_246 = arith.constant 0 : index
    %c0_247 = arith.constant 0 : index
    %267 = vector.load %arg12[%c0_245, %c0_246, %c0_247] : memref<1x8x32xf32, #tpu.memory_space<vmem>>, vector<1x8x32xf32>
    %268 = vector.shape_cast %267 : vector<1x8x32xf32> to vector<8x32xf32>
    %269 = vector.shape_cast %266 : vector<8x32xf32> to vector<1x8x32xf32>
    tpu.vector_store %arg12[%c0_245, %c0_246, %c0_247], %269 {strides = array<i32>} : memref<1x8x32xf32, #tpu.memory_space<vmem>>, vector<1x8x32xf32>,
    return
  }
  func.func @transform_0(%arg0: i32) -> (i32, i32, i32) {
    %c0_i32 = arith.constant 0 : i32
    %c0_i32_0 = arith.constant 0 : i32
    %c0_i32_1 = arith.constant 0 : i32
    return %arg0, %c0_i32, %c0_i32_0 : i32, i32, i32
  }
  func.func @transform_1(%arg0: i32) -> (i32, i32, i32) {
    %c0_i32 = arith.constant 0 : i32
    %c0_i32_0 = arith.constant 0 : i32
    %c0_i32_1 = arith.constant 0 : i32
    return %arg0, %c0_i32, %c0_i32_0 : i32, i32, i32
  }
  func.func @transform_2(%arg0: i32) -> (i32, i32, i32) {
    %c0_i32 = arith.constant 0 : i32
    %c0_i32_0 = arith.constant 0 : i32
    %c0_i32_1 = arith.constant 0 : i32
    return %arg0, %c0_i32, %c0_i32_0 : i32, i32, i32
  }
  func.func @transform_3(%arg0: i32) -> (i32, i32) {
    %c0_i32 = arith.constant 0 : i32
    %c0_i32_0 = arith.constant 0 : i32
    %c0_i32_1 = arith.constant 0 : i32
    return %c0_i32, %c0_i32_0 : i32, i32
  }
  func.func @transform_4(%arg0: i32) -> (i32, i32) {
    %c0_i32 = arith.constant 0 : i32
    %c0_i32_0 = arith.constant 0 : i32
    %c0_i32_1 = arith.constant 0 : i32
    return %c0_i32, %c0_i32_0 : i32, i32
  }
  func.func @transform_5(%arg0: i32) -> (i32, i32) {
    %c0_i32 = arith.constant 0 : i32
    %c0_i32_0 = arith.constant 0 : i32
    %c0_i32_1 = arith.constant 0 : i32
    return %c0_i32, %c0_i32_0 : i32, i32
  }
  func.func @transform_6(%arg0: i32) -> (i32, i32, i32) {
    %c0_i32 = arith.constant 0 : i32
    %c0_i32_0 = arith.constant 0 : i32
    %c0_i32_1 = arith.constant 0 : i32
    %c0_i32_2 = arith.constant 0 : i32
    return %c0_i32, %c0_i32_0, %c0_i32_1 : i32, i32, i32
  }
  func.func @transform_7(%arg0: i32) -> (i32, i32) {
    %c0_i32 = arith.constant 0 : i32
    %c0_i32_0 = arith.constant 0 : i32
    %c0_i32_1 = arith.constant 0 : i32
    return %c0_i32, %c0_i32_0 : i32, i32
  }
  func.func @transform_8(%arg0: i32) -> (i32, i32) {
    %c0_i32 = arith.constant 0 : i32
    %c0_i32_0 = arith.constant 0 : i32
    %c0_i32_1 = arith.constant 0 : i32
    return %c0_i32, %c0_i32_0 : i32, i32
  }
  func.func @transform_9(%arg0: i32) -> (i32, i32) {
    %c0_i32 = arith.constant 0 : i32
    %c0_i32_0 = arith.constant 0 : i32
    %c0_i32_1 = arith.constant 0 : i32
    return %c0_i32, %c0_i32_0 : i32, i32
  }
  func.func @transform_10(%arg0: i32) -> (i32, i32) {
    %c0_i32 = arith.constant 0 : i32
    %c0_i32_0 = arith.constant 0 : i32
    %c0_i32_1 = arith.constant 0 : i32
    return %c0_i32, %c0_i32_0 : i32, i32
  }
  func.func @transform_11(%arg0: i32) -> (i32, i32, i32) {
    %c0_i32 = arith.constant 0 : i32
    %c0_i32_0 = arith.constant 0 : i32
    %c0_i32_1 = arith.constant 0 : i32
    return %arg0, %c0_i32, %c0_i32_0 : i32, i32, i32
  }
  func.func @transform_12(%arg0: i32) -> (i32, i32, i32) {
    %c0_i32 = arith.constant 0 : i32
    %c0_i32_0 = arith.constant 0 : i32
    %c0_i32_1 = arith.constant 0 : i32
    return %arg0, %c0_i32, %c0_i32_0 : i32, i32, i32
  }
}

</mosaic_0001>

<bundles_post_ra>
// kernel: tpu_custom_call.1
= control target key start
LH: loop header
LB: loop body
LE: loop exit
PB: predicated region body
PF: predicated region fallthrough
CT: control target
= control target key end

     0   :  { %s3452_s0 = inlined_call_operand.hbm [shape: f32[2,8,32], index: 0, kind: input, shape index: {}]   ;;  %s3453_s1 = inlined_call_operand.hbm [shape: f32[2,8,32], index: 1, kind: input, shape index: {}]   ;;  %s3454_s2 = inlined_call_operand.hbm [shape: f32[2,8,32], index: 2, kind: input, shape index: {}]   ;;  %s3455_s3 = inlined_call_operand.hbm [shape: bf16[32,32], index: 3, kind: input, shape index: {}]   ;;  %s3456_s4 = inlined_call_operand.hbm [shape: bf16[32,32], index: 4, kind: input, shape index: {}]   ;;  %s3457_s5 = inlined_call_operand.vmem [shape: bf16[32,32], index: 5, kind: input, shape index: {}]   ;;  %s3458_s6 = inlined_call_operand.hbm [shape: bf16[4,8,32], index: 6, kind: input, shape index: {}]   ;;  %s3459_s7 = inlined_call_operand.vmem [shape: f32[8,8], index: 7, kind: input, shape index: {}]   ;;  %s3460_s8 = inlined_call_operand.hbm [shape: f32[8,8], index: 8, kind: input, shape index: {}]   ;;  %s3461_s9 = inlined_call_operand.vmem [shape: f32[1,32], index: 9, kind: input, shape index: {}]   ;;  %s3462_s10 = inlined_call_operand.vmem [shape: f32[1,32], index: 10, kind: input, shape index: {}]   ;;  %s3463_s11 = inlined_call_operand.hbm [shape: f32[2,8,32], index: 11, kind: output, shape index: {0}]   ;;  %s3464_s12 = inlined_call_operand.hbm [shape: f32[2,8,8], index: 12, kind: output, shape index: {1}]  }
   0x1   :  { %3489 = sst [smem:[#allocation32_spill]] %s3453_s1 }
   0x2   :  { %3490 = sst [smem:[#allocation33_spill]] %s3455_s3 }
   0x3   :  { %3491 = sst [smem:[#allocation34_spill]] %s3458_s6 }
   0x4   :  { %3492 = sst [smem:[#allocation35_spill]] %s3459_s7 }
   0x5   :  { %3493 = sst [smem:[#allocation36_spill]] %s3461_s9 }
   0x6   :  { %3494 = sst [smem:[#allocation37_spill]] %s3462_s10 }
   0x7   :  { %3495 = sst [smem:[#allocation38_spill]] %s3463_s11 }
   0x8   :  { %3496 = sst [smem:[#allocation39_spill]] %s3464_s12 }
   0x9   :  { %18 = vsyncpa [#allocation6], 0 }
   0xa   :  { %20 = vsyncpa [#allocation6 + $0x1], 0 }
   0xb   :  { %21 = vsyncpa [#allocation9], 0 }
   0xc   :  { %23 = vsyncpa [#allocation9 + $0x1], 0 }
   0xd   :  { %24 = vsyncpa [#allocation12], 0 }
   0xe   :  { %25 = vsyncpa [#allocation15], 0 }
   0xf   :  { %26 = vsyncpa [#allocation7], 0 }
  0x10   :  { %28 = vsyncpa [#allocation7 + $0x1], 0 }
  0x11   :  { %29 = vsyncpa [#allocation19], 0 }
  0x12   :  { %31 = vsyncpa [#allocation19 + $0x1], 0  ;;  %s2833_s21 = smov 0   ;;  %s2835_s22 = smov 0  }
  0x13   :  { %s2837_s23 = smov 0   ;;  %s2839_s24 = smov 0  }
  0x14 LB: > { %3497 = sst [smem:[#allocation26_spill]] %s2738_s21  ;;  %s2752_s25 = smov [#allocation11]   ;;  %s2750_s24 = sphi %s2839_s24, %s3540_s24   ;;  %s2746_s23 = sphi %s2837_s23, %s3544_s23   ;;  %s2742_s22 = sphi %s2835_s22, %s3543_s22   ;;  %s2738_s21 = sphi %s2833_s21, %s3542_s21  }
  0x15   : > { %3498 = sst [smem:[#allocation27_spill]] %s2750_s24  ;;  %s352_s26 = sshll.u32 %s2752_s25, 4  ;;  %s2859_s26 = int_to_ptr.vmem [resolvable:$true] %s352_s26 }
  0x16   : > { %s2854_s27 = sadd.s32 4294967295, %s2750_s24   ;;  %p2095_p0 = scmp.ge.s32.totalorder %s2750_s24, 1 }
  0x17   : > { %p3475_p1 = scmp.eq.s32.totalorder %s2854_s27, 0  ;;  %p340_p2 = scmp.lt.s32.totalorder %s2750_s24, 3 }
  0x18   : > { %s2753_s29 = smov [#allocation14]   ;;  %s3501_s3 = sld [smem:[#allocation33_spill]] }
  0x19   : > { %p2861_p3 = pnand %p2095_p0, %p340_p2  ;;  %s381_s30 = sshll.u32 %s2753_s29, 4  ;;  %s2874_s30 = int_to_ptr.vmem [resolvable:$true] %s381_s30 }
  0x1b   : > { %s3499_s28 = scalar_select %p2861_p3, 1, 0 }
  0x1c   : > { %p2331_p5 = pneg %p2861_p3 }
  0x1e   : > { %p2870_p6 = pnand %p2331_p5, %p3475_p1  ;;  %s2438_s16 = scalar_lea.hbm %s3501_s3, 256 }
  0x1f   : > { %p2439_p7 = scmp.ne.s32.totalorder %s3501_s3, %s2438_s16  ;;  %p2445_p11 = scmp.lt.u32.totalorder %s2438_s16, %s3501_s3 }
  0x20   : > { %s3500_s13 = scalar_select %p2870_p6, 1, 0 }
  0x21   : > { %p2884_p8 = pneg %p2870_p6 }
  0x23   : > { %s3502_s19 = scalar_select %p2884_p8, 1, 0 }
  0x24   : > { %p2441_p9 = pnand %p2884_p8, %p2439_p7 }
  0x26   : > { %p2442_p10 = pneg %p2441_p9 }
  0x28   : > { %p2447_p12 = pnand %p2445_p11, %p2442_p10 }
  0x2a   : > { %2450 = shalt.err (!%p2447_p12)
}
  0x2b   : > { %s2451_s29 = scalar_lea.vmem %s2859_s26, 256  ;;  %p2459_p5 = scmp.lt.s32.totalorder %s2859_s26, %s2859_s26 }
  0x2c   : > { %p2452_p13 = scmp.ne.s32.totalorder %s2859_s26, %s2451_s29  ;;  %p2460_p4 = scmp.lt.s32.totalorder %s2451_s29, %s2451_s29 }
  0x2e   : > { %p2454_p0 = pnand %p2452_p13, %p2884_p8  ;;  %p2461_p7 = por %p2460_p4, %p2459_p5 }
  0x30   : > { %p2455_p2 = pneg %p2454_p0 }
  0x32   : > { %p2462_p9 = pnand %p2461_p7, %p2455_p2 }
  0x34   : > { %2465 = shalt.err (!%p2462_p9)
}
  0x35   : > { %s3467_s14 = smov 64   ;;  %s3468_s15 = smov 4  }
  0x36   : > { %2334 = dma.hbm_to_vmem [thread:$0]  (!%p2870_p6), %s3501_s3, 256, %s2859_s26, [#allocation12], %s3467_s14, %s3467_s14, %s3468_s15  }
  0x37   : > { %s3503_s6 = sld [smem:[#allocation34_spill]] }
  0x3d   : > { %s2466_s25 = scalar_lea.hbm %s3503_s6, 256 }
  0x3e   : > { %p2467_p4 = scmp.ne.s32.totalorder %s3503_s6, %s2466_s25  ;;  %p2473_p12 = scmp.lt.u32.totalorder %s2466_s25, %s3503_s6 }
  0x40   : > { %p2469_p10 = pnand %p2467_p4, %p2884_p8 }
  0x42   : > { %p2470_p11 = pneg %p2469_p10 }
  0x44   : > { %p2475_p13 = pnand %p2473_p12, %p2470_p11 }
  0x46   : > { %2478 = shalt.err (!%p2475_p13)
}
  0x47   : > { %s2479_s26 = scalar_lea.vmem %s2874_s30, 256  ;;  %p2487_p7 = scmp.lt.s32.totalorder %s2874_s30, %s2874_s30 }
  0x48   : > { %p2480_p0 = scmp.ne.s32.totalorder %s2874_s30, %s2479_s26  ;;  %p2488_p9 = scmp.lt.s32.totalorder %s2479_s26, %s2479_s26 }
  0x4a   : > { %p2482_p2 = pnand %p2480_p0, %p2884_p8  ;;  %p2489_p4 = por %p2488_p9, %p2487_p7 }
  0x4c   : > { %p2483_p5 = pneg %p2482_p2 }
  0x4e   : > { %p2490_p10 = pnand %p2489_p4, %p2483_p5 }
  0x50   : > { %2493 = shalt.err (!%p2490_p10)
}
  0x51   : > { %2340 = dma.hbm_to_vmem [thread:$0]  (!%p2870_p6), %s3503_s6, 256, %s2874_s30, [#allocation15], %s3467_s14, %s3467_s14, %s3468_s15  }
  0x52   : > { %s2094_s11 = sadd.s32 4294967294, %s2750_s24   ;;  %s2936_s16 = sadd.s32 1, %s2750_s24  }
  0x53   : > { %3504 = sst [smem:[#allocation28_spill]] %s2936_s16  ;;  %s41_s17 = ssub.s32 %s2750_s24, %s2936_s16 }
  0x54   : > { %s44_s18 = sadd.s32 1, %s2746_s23  ;;  %p42_p11 = scmp.eq.s32.totalorder %s41_s17, 0 }
  0x55   : > { %p51_p12 = scmp.ne.s32.totalorder %s2746_s23, %s2742_s22  ;;  %p52_p13 = scmp.eq.s32.totalorder %s2750_s24, 0 }
  0x56   : > { %p57_p0 = scmp.ne.s32.totalorder %s2742_s22, %s2738_s21  ;;  %p301_p7 = scmp.eq.s32.totalorder %s2854_s27, 1 }
  0x57   : > { %s2947_s20 = scalar_select %p42_p11, %s2746_s23, %s44_s18  }
  0x58   : > { %p53_p2 = por %p52_p13, %p51_p12  ;;  %p2951_p5 = por %p3475_p1, %p57_p0 }
  0x59   : > { %3505 = sst [smem:[#allocation29_spill]] %s2947_s20  ;;  %p307_p9 = scmp.eq.s32.totalorder %s2094_s11, 1 }
  0x5a   : > { %s3506_s25 = scalar_select %p2951_p5, 1, 0 }
  0x5b   : > { %p2365_p4 = scmp.lt.s32.totalorder %s2750_s24, 2  ;;  %s3469_s30 = sand.u32 1, %s2746_s23  }
  0x5c   : > { %p2958_p10 = por %p301_p7, %p51_p12  ;;  %p2962_p3 = por %p307_p9, %p57_p0 }
  0x5d   : > { %s2968_s9 = sshll.u32 %s3469_s30, 3  ;;  %s2971_s10 = sshll.u32 %s2750_s24, 7 }
  0x5e   : > { %s3507_s29 = scalar_select %p2958_p10, 1, 0 }
  0x5f   : > { %s3509_s26 = scalar_select %p2962_p3, 1, 0 }
  0x60   : > { %3508 = sst [smem:[#allocation30_spill]] %s3507_s29  ;;  %p2973_p11 = pnand %p2365_p4, %p53_p2 }
  0x61   : > { %3510 = sst [smem:[#allocation31_spill]] %s3509_s26  ;;  %s433_s11 = sand.u32 1, %s2750_s24  }
  0x62   : > { %s3511_s17 = scalar_select %p2973_p11, 1, 0 }
  0x63   : > { %s3512_s1 = sld [smem:[#allocation32_spill]]  ;;  %s437_s30 = scalar_lea.vmem [#allocation8], %s2968_s9 }
  0x64   : > { %s444_s3 = sshll.u32 %s437_s30, 4  ;;  %s2756_s6 = smov [#allocation13]   ;;  %s2985_s3 = int_to_ptr.vmem [resolvable:$true] %s444_s3 }
  0x65   : > { %s2987_s20 = sshll.u32 %s2756_s6, 4  ;;  %s2989_s16 = scalar_lea.sflag [#allocation9], %s433_s11  ;;  %s366_s20 = int_to_ptr.vmem [resolvable:$true] %s2987_s20 }
  0x66   : > { %p2995_p13 = pneg %p2973_p11 }
  0x68   : > { %s3513_s14 = scalar_select %p2995_p13, 1, 0 }
  0x69   : > { %s2982_s15 = scalar_lea.hbm %s3512_s1, %s2971_s10  ;;  %s2499_s24 = scalar_lea.hbm %s3512_s1, 256 }
  0x6a   : > { %s2494_s26 = scalar_lea.hbm %s2982_s15, 128  ;;  %p2500_p7 = scmp.lt.u32.totalorder %s2982_s15, %s3512_s1 }
  0x6b   : > { %p2495_p12 = scmp.ne.s32.totalorder %s2982_s15, %s2494_s26  ;;  %p2501_p9 = scmp.lt.u32.totalorder %s2499_s24, %s2494_s26 }
  0x6c   : > { %p2503_p1 = scmp.lt.u32.totalorder %s2494_s26, %s2982_s15 }
  0x6d   : > { %p2497_p0 = pnand %p2995_p13, %p2495_p12  ;;  %p2502_p4 = por %p2501_p9, %p2500_p7 }
  0x6f   : > { %p2498_p2 = pneg %p2497_p0  ;;  %p2504_p3 = por %p2503_p1, %p2502_p4 }
  0x71   : > { %p2505_p10 = pnand %p2504_p3, %p2498_p2 }
  0x73   : > { %2508 = shalt.err (!%p2505_p10)
}
  0x74   : > { %s2509_s11 = scalar_lea.vmem %s2985_s3, 128  ;;  %s2757_s18 = smov [#allocation8]  }
  0x75   : > { %p2510_p12 = scmp.ne.s32.totalorder %s2985_s3, %s2509_s11  ;;  %s2514_s30 = sshll.u32 %s2757_s18, 4  ;;  %s2515_s30 = int_to_ptr.vmem [resolvable:$false] %s2514_s30 }
  0x76   : > { %s2516_s21 = scalar_lea.vmem %s2515_s30, 256  ;;  %p2517_p6 = scmp.lt.s32.totalorder %s2985_s3, %s2515_s30 }
  0x77   : > { %p2512_p0 = pnand %p2510_p12, %p2995_p13  ;;  %p2518_p8 = scmp.lt.s32.totalorder %s2516_s21, %s2509_s11 }
  0x79   : > { %p2513_p5 = pneg %p2512_p0  ;;  %p2519_p7 = por %p2518_p8, %p2517_p6 }
  0x7b   : > { %p2520_p9 = pnand %p2519_p7, %p2513_p5 }
  0x7d   : > { %2523 = shalt.err (!%p2520_p9)
}
  0x7e   : > { %2350 = dma.hbm_to_vmem [thread:$0]  (!%p2973_p11), %s2982_s15, 128, %s2985_s3, %s2989_s16  }
  0x7f   : > { %s2524_s6 = scalar_lea.hbm %s3456_s4, 256  ;;  %p3514_p3 = scmp.ne.s32.totalorder %s3502_s19, 0 }
  0x80   : > { %p2525_p1 = scmp.ne.s32.totalorder %s3456_s4, %s2524_s6  ;;  %p2531_p5 = scmp.lt.u32.totalorder %s2524_s6, %s3456_s4 }
  0x82   : > { %p2527_p6 = pnand %p2525_p1, %p3514_p3 }
  0x84   : > { %p2528_p8 = pneg %p2527_p6 }
  0x86   : > { %p2533_p10 = pnand %p2531_p5, %p2528_p8 }
  0x88   : > { %2536 = shalt.err (!%p2533_p10)
}
  0x89   : > { %s2537_s21 = scalar_lea.vmem %s366_s20, 256  ;;  %p2545_p0 = scmp.lt.s32.totalorder %s366_s20, %s366_s20 }
  0x8a   : > { %p2538_p2 = scmp.ne.s32.totalorder %s366_s20, %s2537_s21  ;;  %p2546_p7 = scmp.lt.s32.totalorder %s2537_s21, %s2537_s21 }
  0x8c   : > { %p2540_p4 = pnand %p2538_p2, %p3514_p3  ;;  %p2547_p9 = por %p2546_p7, %p2545_p0 }
  0x8e   : > { %p2541_p12 = pneg %p2540_p4 }
  0x90   : > { %p2548_p11 = pnand %p2547_p9, %p2541_p12 }
  0x92   : > { %2551 = shalt.err (!%p2548_p11)
}
  0x93   : > { %p3515_p1 = scmp.ne.s32.totalorder %s3500_s13, 0  ;;  %s3516_s1 = smov 4  }
  0x94   : > { %s3517_s3 = smov 64   ;;  %s2758_s26 = smov [#allocation16]  }
  0x95   : > { %2337 = dma.hbm_to_vmem [thread:$0]  (!%p3515_p1), %s3456_s4, 256, %s366_s20, [#allocation12], %s3517_s3, %s3517_s3, %s3516_s1  }
  0x96   : > { %s398_s6 = sshll.u32 %s2758_s26, 4  ;;  %s2552_s30 = scalar_lea.hbm %s3460_s8, 128  ;;  %s399_s6 = int_to_ptr.vmem [resolvable:$true] %s398_s6 }
  0x97   : > { %p2553_p11 = scmp.ne.s32.totalorder %s3460_s8, %s2552_s30  ;;  %p2559_p5 = scmp.lt.u32.totalorder %s2552_s30, %s3460_s8 }
  0x99   : > { %p2555_p6 = pnand %p2553_p11, %p3514_p3 }
  0x9b   : > { %p2556_p8 = pneg %p2555_p6 }
  0x9d   : > { %p2561_p10 = pnand %p2559_p5, %p2556_p8 }
  0x9f   : > { %2564 = shalt.err (!%p2561_p10)
}
  0xa0   : > { %s2565_s20 = scalar_lea.vmem %s399_s6, 128  ;;  %p2573_p0 = scmp.lt.s32.totalorder %s399_s6, %s399_s6 }
  0xa1   : > { %p2566_p2 = scmp.ne.s32.totalorder %s399_s6, %s2565_s20  ;;  %p2574_p7 = scmp.lt.s32.totalorder %s2565_s20, %s2565_s20 }
  0xa3   : > { %p2568_p4 = pnand %p2566_p2, %p3514_p3  ;;  %p2575_p9 = por %p2574_p7, %p2573_p0 }
  0xa5   : > { %p2569_p12 = pneg %p2568_p4 }
  0xa7   : > { %p2576_p13 = pnand %p2575_p9, %p2569_p12 }
  0xa9   : > { %2579 = shalt.err (!%p2576_p13)
}
  0xaa   : > { %2343 = dma.hbm_to_vmem [thread:$0]  (!%p3515_p1), %s3460_s8, 128, %s399_s6, [#allocation15]  }
  0xab   : > { %s3063_s19 = scalar_lea.hbm %s3452_s0, %s2971_s10  ;;  %s419_s3 = scalar_lea.vmem [#allocation5], %s2968_s9 }
  0xac   : > { %s426_s15 = sshll.u32 %s419_s3, 4  ;;  %s3518_s13 = sand.u32 1, %s2746_s23   ;;  %s427_s15 = int_to_ptr.vmem [resolvable:$true] %s426_s15 }
  0xad   : > { %s416_s24 = scalar_lea.sflag [#allocation6], %s3518_s13  ;;  %s2580_s26 = scalar_lea.hbm %s3063_s19, 128 }
  0xae   : > { %p2581_p13 = scmp.ne.s32.totalorder %s3063_s19, %s2580_s26  ;;  %p3519_p3 = scmp.ne.s32.totalorder %s3513_s14, 0 }
  0xaf   : > { %s2585_s11 = scalar_lea.hbm %s3452_s0, 256  ;;  %p2586_p1 = scmp.lt.u32.totalorder %s3063_s19, %s3452_s0 }
  0xb0   : > { %p2583_p11 = pnand %p2581_p13, %p3519_p3  ;;  %p2587_p8 = scmp.lt.u32.totalorder %s2585_s11, %s2580_s26 }
  0xb1   : > { %p2589_p10 = scmp.lt.u32.totalorder %s2580_s26, %s3063_s19 }
  0xb2   : > { %p2584_p6 = pneg %p2583_p11  ;;  %p2588_p5 = por %p2587_p8, %p2586_p1 }
  0xb4   : > { %p2590_p2 = por %p2589_p10, %p2588_p5 }
  0xb6   : > { %p2591_p4 = pnand %p2590_p2, %p2584_p6 }
  0xb8   : > { %2594 = shalt.err (!%p2591_p4)
}
  0xb9   : > { %s2595_s20 = scalar_lea.vmem %s427_s15, 128  ;;  %s2759_s12 = smov [#allocation5]  }
  0xba   : > { %p2596_p12 = scmp.ne.s32.totalorder %s427_s15, %s2595_s20  ;;  %s2600_s1 = sshll.u32 %s2759_s12, 4  ;;  %s2601_s1 = int_to_ptr.vmem [resolvable:$false] %s2600_s1 }
  0xbb   : > { %s2602_s7 = scalar_lea.vmem %s2601_s1, 256  ;;  %p2603_p9 = scmp.lt.s32.totalorder %s427_s15, %s2601_s1 }
  0xbc   : > { %p2598_p0 = pnand %p2596_p12, %p3519_p3  ;;  %p2604_p13 = scmp.lt.s32.totalorder %s2602_s7, %s2595_s20 }
  0xbe   : > { %p2599_p7 = pneg %p2598_p0  ;;  %p2605_p11 = por %p2604_p13, %p2603_p9 }
  0xc0   : > { %p2606_p1 = pnand %p2605_p11, %p2599_p7 }
  0xc2   : > { %2609 = shalt.err (!%p2606_p1)
}
  0xc3   : > { %p3520_p8 = scmp.ne.s32.totalorder %s3511_s17, 0  ;;  %s3089_s13 = scalar_lea.hbm %s3454_s2, %s2971_s10 }
  0xc4   : > { %s455_s26 = scalar_lea.vmem [#allocation10], %s2968_s9  ;;  %s2610_s18 = scalar_lea.hbm %s3089_s13, 128 }
  0xc5   : > { %2347 = dma.hbm_to_vmem [thread:$0]  (!%p3520_p8), %s3063_s19, 128, %s427_s15, %s416_s24  }
  0xc6   : > { %s462_s6 = sshll.u32 %s455_s26, 4  ;;  %p2611_p6 = scmp.ne.s32.totalorder %s3089_s13, %s2610_s18  ;;  %s463_s6 = int_to_ptr.vmem [resolvable:$true] %s462_s6 }
  0xc7   : > { %s2615_s19 = scalar_lea.hbm %s3454_s2, 256  ;;  %p2616_p2 = scmp.lt.u32.totalorder %s3089_s13, %s3454_s2 }
  0xc8   : > { %p2613_p5 = pnand %p2611_p6, %p3519_p3  ;;  %p2617_p4 = scmp.lt.u32.totalorder %s2615_s19, %s2610_s18 }
  0xc9   : > { %p2619_p0 = scmp.lt.u32.totalorder %s2610_s18, %s3089_s13 }
  0xca   : > { %p2614_p10 = pneg %p2613_p5  ;;  %p2618_p12 = por %p2617_p4, %p2616_p2 }
  0xcc   : > { %p2620_p7 = por %p2619_p0, %p2618_p12 }
  0xce   : > { %p2621_p9 = pnand %p2620_p7, %p2614_p10 }
  0xd0   : > { %2624 = shalt.err (!%p2621_p9)
}
  0xd1   : > { %s2625_s9 = scalar_lea.vmem %s463_s6, 128  ;;  %s2760_s10 = smov [#allocation10]  }
  0xd2   : > { %p2626_p13 = scmp.ne.s32.totalorder %s463_s6, %s2625_s9  ;;  %s2630_s21 = sshll.u32 %s2760_s10, 4  ;;  %s2631_s21 = int_to_ptr.vmem [resolvable:$false] %s2630_s21 }
  0xd3   : > { %s2632_s20 = scalar_lea.vmem %s2631_s21, 256  ;;  %p2633_p6 = scmp.lt.s32.totalorder %s463_s6, %s2631_s21 }
  0xd4   : > { %p2628_p11 = pnand %p2626_p13, %p3519_p3  ;;  %p2634_p5 = scmp.lt.s32.totalorder %s2632_s20, %s2625_s9 }
  0xd6   : > { %p2629_p1 = pneg %p2628_p11  ;;  %p2635_p8 = por %p2634_p5, %p2633_p6 }
  0xd8   : > { %p2636_p2 = pnand %p2635_p8, %p2629_p1 }
  0xda   : > { %2639 = shalt.err (!%p2636_p2)
}
  0xdb   : > { %p3521_p4 = scmp.ne.s32.totalorder %s3511_s17, 0  ;;  %p3522_p10 = scmp.ne.s32.totalorder %s3499_s28, 0 }
  0xdc   : > { %s3113_s14 = sand.u32 (!%p3522_p10), 1, %s2742_s22   ;;  %p3523_p3 = scmp.ne.s32.totalorder (!%p3522_p10), %s3506_s25, 0 }
  0xdd   : > { %2353 = dma.hbm_to_vmem [thread:$0]  (!%p3521_p4), %s3089_s13, 128, %s463_s6, %s2989_s16  }
  0xde   : > { %471 = sbr.rel (%p3522_p10) target bundleno = 2191 (0x88f), region = 64  ;;  %s3116_s12 = sshll.u32 (!%p3522_p10), %s3113_s14, 3 }
  0xdf   : > { %s474_s1 = scalar_lea.sflag (!%p3522_p10), [#allocation6], %s3113_s14  ;;  %s477_s7 = scalar_lea.vmem (!%p3522_p10), [#allocation5], %s3116_s12 }
  0xe5   : > { %2713 = dma.done.wait (%p3523_p3), %s474_s1, 128  }
  0xe6   : > { %2715 = vsyncadd (%p3523_p3), %s474_s1, 4294967168  ;;  %s482_s28 = sand.u32 1, %s2854_s27   ;;  %s486_s17 = scalar_lea.vmem [#allocation8], %s3116_s12 }
  0xe7   : > { %s483_s16 = scalar_lea.sflag [#allocation9], %s482_s28 }
  0xe8   : > { %2717 = dma.done.wait (%p3523_p3), %s483_s16, 256  }
  0xe9   : > { %2719 = vsyncadd (%p3523_p3), %s483_s16, 4294967040  ;;  %s495_s29 = scalar_lea.vmem [#allocation10], %s3116_s12  ;;  %p3524_p8 = scmp.eq.s32.totalorder %s2854_s27, 0 }
  0xeb   : > { %2721 = dma.done.wait (%p3524_p8), [#allocation12], 512   ;;  %p3525_p12 = pmov %p3524_p8 }
  0xec   : > { %p3526_p0 = pmov %p3524_p8 }
  0xed   : > { %2723 = vsyncadd (%p3525_p12), [#allocation12], 4294966784 }
  0xee   : > { %2725 = dma.done.wait (%p3526_p0), [#allocation15], 384   ;;  %p3527_p7 = pmov %p3526_p0 }
  0xef   : > { %v2761_v0 = vmov 0.0   ;;  %vm2762_vm0 = vmmov 0   ;;  %v2414_v1 = vld [vmem:[#allocation13] sm:$0xff]   ;;  %v2415_v2 = vld [vmem:[#allocation11] sm:$0xff]   ;;  %v2416_v3 = vld [vmem:[#allocation13 + $0x8] sm:$0xff]   ;;  %vm590_vm1 = vcmask 261120  }
  0xf0   : > { %2727 = vsyncadd (%p3527_p7), [#allocation15], 4294966912  ;;  %2202 = vmatprep.subr.bf16.mxu1 %v2761_v0  ;;  %2194 = vmatprep.subr.bf16.mxu0 %v2761_v0  ;;  %v2417_v4 = vld [vmem:[#allocation11 + $0x8] sm:$0xff]   ;;  %v3147_v6 = vld [vmem:[%s477_s7] sm:$0xff]  ;;  %vm759_vm2 = vcmask 57344   ;;  %s2763_s13 = smov 112  }
  0xf1   : > { %2206 = vmatprep.mubr.msk.bf16.mxu1 %vm2762_vm0, %v2761_v0  ;;  %2198 = vmatprep.mubr.msk.bf16.mxu0 %vm2762_vm0, %v2761_v0  ;;  %v635_v5 = vld [vmem:[%s486_s17] sm:$0xff]  ;;  %v573_v8 = vpack.c.bf16 %v3147_v6, %v3147_v6  ;;  %s2764_s26 = smov 120   ;;  %s2765_s11 = smov 104   ;;  %v697_v33 = vld [vmem:[%s495_s29] sm:$0xff]  ;;  %vm792_vm3 = vcmask 59394   ;;  %vm770_vm4 = vcmask 58369  }
  0xf2   : > { %2203 = vmatpush3.bf16.msra.mxu1 %v2414_v1  ;;  %2195 = vmatpush3.bf16.msra.mxu0 %v2415_v2  ;;  %v636_v7 = vpack.c.bf16 %v635_v5, %v635_v5  ;;  %v2418_v10 = vld [vmem:[%s3457_s5] sm:$0xff]   ;;  %v2419_v26 = vld [vmem:[%s3457_s5 + $0x8] sm:$0xff]   ;;  %v698_v34 = vpack.c.bf16 %v697_v33, %v697_v33  ;;  %vm808_vm5 = vcmask 60419   ;;  %vm976_vm6 = vcmask 64512   ;;  %s3528_s15 = sld [smem:[#allocation35_spill]]  ;;  %s3529_s24 = sld [smem:[#allocation30_spill]] }
  0xf3   : > { %2204 = vmatprep.subr.bf16.mxu1 %v2761_v0  ;;  %2196 = vmatprep.subr.bf16.mxu0 %v2761_v0  ;;  %vm1212_vm7 = vcmask 1043456   ;;  %s2148_s9 = sshll.u32 %s2854_s27, 7  ;;  %s566_s10 = scalar_lea.vmem [#allocation18], %s3116_s12 }
  0xf4   : > { %s3530_s1 = sld [smem:[#allocation39_spill]]  ;;  %s1911_s28 = sshll.u32 %s566_s10, 4  ;;  %s1912_s28 = int_to_ptr.vmem [resolvable:$true] %s1911_s28 }
  0xf5   : > { %s1885_s16 = scalar_lea.sflag [#allocation19], %s3113_s14  ;;  %s2640_s17 = scalar_lea.vmem %s1912_s28, 128 }
  0xf6   : > { %2205 = vmatpush3.bf16.msra.mxu1 %v2416_v3  ;;  %2197 = vmatpush3.bf16.msra.mxu0 %v2417_v4  ;;  %p2641_p9 = scmp.ne.s32.totalorder %s1912_s28, %s2640_s17  ;;  %s2766_s29 = smov [#allocation18]  }
  0xf7   : > { %2218 = vmatprep.subr.bf16.mxu1 %v2761_v0  ;;  %2210 = vmatprep.subr.bf16.mxu0 %v2761_v0  ;;  %s2644_s25 = sshll.u32 %s2766_s29, 4  ;;  %s2645_s25 = int_to_ptr.vmem [resolvable:$false] %s2644_s25 }
  0xf8   : > { %p3531_p13 = scmp.ne.s32.totalorder %s3529_s24, 0  ;;  %s2646_s3 = scalar_lea.vmem %s2645_s25, 256 }
  0xf9   : > { %2207 = vmatmul.mubr.msk.bf16.vlgmr.msra.gmra.mrb[0].mxu1 %vm590_vm1, %v636_v7  ;;  %2199 = vmatmul.mubr.msk.bf16.vlgmr.msra.gmra.mrb[0].mxu0 %vm590_vm1, %v573_v8  ;;  %p2647_p6 = scmp.lt.s32.totalorder %s1912_s28, %s2645_s25  ;;  %p2648_p5 = scmp.lt.s32.totalorder %s2646_s3, %s2640_s17 }
  0xfa   : > { %2220 = vmatprep.mubr.msk.bf16.mxu1 %vm2762_vm0, %v2761_v0  ;;  %2214 = vmatprep.mubr.msk.bf16.mxu0 %vm2762_vm0, %v2761_v0  ;;  %s3375_s7 = scalar_lea.hbm %s3530_s1, %s2148_s9  ;;  %p2642_p11 = pnand %p2641_p9, %p3531_p13 }
  0xfb   : > { %2211 = vmatpush3.bf16.msra.mxu0 %v2418_v10  ;;  %p2649_p2 = por %p2648_p5, %p2647_p6 }
  0xfc   : > { %2212 = vmatprep.subr.bf16.mxu0 %v2761_v0  ;;  %p2643_p1 = pneg %p2642_p11 }
  0xfe   : > { %p2650_p4 = pnand %p2649_p2, %p2643_p1 }
  0xff   : > { %2213 = vmatpush3.bf16.msra.mxu0 %v2419_v26 }
 0x100   : > { %2224 = vmatprep.subr.bf16.mxu0 %v2761_v0 }
 0x102   : > { %2215 = vmatmul.mubr.msk.bf16.vlgmr.msra.gmra.mrb[4].mxu0 %vm590_vm1, %v698_v34 }
 0x103   : > { %2226 = vmatprep.mubr.msk.bf16.mxu0 %vm2762_vm0, %v2761_v0 }
 0x1cc   : > { %v690_v9 = vpop.f32.mrb[0].mxu1  ;;  %v628_v12 = vpop.f32.mrb[0].mxu0 }
 0x1cd   : > { %v696_v11 = vpack.c.bf16 %v690_v9, %v690_v9  ;;  %v2208_v13 = vpop.f32.mrb[1].mxu1  ;;  %v634_v14 = vpack.c.bf16 %v628_v12, %v628_v12  ;;  %v2200_v15 = vpop.f32.mrb[1].mxu0 }
 0x1ce   : > { %v693_v16 = vpop.f32.mrb[2].mxu1  ;;  %v631_v17 = vpop.f32.mrb[2].mxu0 }
 0x1cf   : > { %761 = vst.msk [vmem:[#allocation3] sm:$0x1] %vm759_vm2, %v696_v11  ;;  %896 = vrot.lane.b32.xlu0 %v696_v11, %s2763_s13  ;;  %836 = vrot.lane.b32.xlu1 %v696_v11, %s2764_s26  ;;  %v2209_v18 = vpop.f32.mrb[3].mxu1  ;;  %v810_v19 = vrot.slane %v696_v11, 5  ;;  %v775_v20 = vrot.slane %v696_v11, 7  ;;  %v794_v21 = vrot.slane %v696_v11, 6 }
 0x1d0   : > { %760 = vst.msk [vmem:[#allocation2] sm:$0x1] %vm759_vm2, %v634_v14  ;;  %v2201_v22 = vpop.f32.mrb[3].mxu0  ;;  %v788_v23 = vrot.slane %v634_v14, 6  ;;  %v766_v24 = vrot.slane %v634_v14, 7  ;;  %v804_v25 = vrot.slane %v634_v14, 5 }
 0x1d1   : > { %v920_v27 = vrot.slane %v775_v20, 4  ;;  %v824_v28 = vrot.slane %v810_v19, 4  ;;  %v872_v29 = vrot.slane %v794_v21, 4 }
 0x1d2   : > { %v916_v30 = vrot.slane %v766_v24, 4  ;;  %v820_v31 = vrot.slane %v804_v25, 4  ;;  %v868_v32 = vrot.slane %v788_v23, 4 }
 0x1d3   : > { %956 = vrot.lane.b32.xlu1 %v696_v11, %s2765_s11  ;;  %832 = vrot.lane.b32.xlu0 %v634_v14, %s2764_s26  ;;  %923 = vst.msk [vmem:[#allocation3 + $0xc] sm:$0x1] %vm759_vm2, %v920_v27  ;;  %827 = vst.msk [vmem:[#allocation3 + $0x4] sm:$0x1] %vm759_vm2, %v824_v28 }
 0x1d4   : > { %875 = vst.msk [vmem:[#allocation3 + $0x8] sm:$0x1] %vm759_vm2, %v872_v29  ;;  %919 = vst.msk [vmem:[#allocation2 + $0xc] sm:$0x1] %vm759_vm2, %v916_v30 }
 0x1d5   : > { %823 = vst.msk [vmem:[#allocation2 + $0x4] sm:$0x1] %vm759_vm2, %v820_v31  ;;  %871 = vst.msk [vmem:[#allocation2 + $0x8] sm:$0x1] %vm759_vm2, %v868_v32  ;;  %v752_v9 = vpop.f32.mrb[4].mxu0 }
 0x1d6   : > { %v3248_v10 = vpack.c.bf16 %v752_v9, %v752_v9  ;;  %v2216_v11 = vpop.f32.mrb[5].mxu0 }
 0x1d7   : > { %811 = vrot.lane.b32.xlu1 %v810_v19, %s2765_s11  ;;  %776 = vrot.lane.b32.xlu0 %v775_v20, %s2764_s26  ;;  %v755_v12 = vpop.f32.mrb[6].mxu0 }
 0x1d8   : > { %762 = vst.msk [vmem:[#allocation4] sm:$0x1] %vm759_vm2, %v3248_v10  ;;  %v2217_v13 = vpop.f32.mrb[7].mxu0  ;;  %v783_v15 = vrot.slane %v3248_v10, 7  ;;  %v815_v16 = vrot.slane %v3248_v10, 5 }
 0x1da   : > { %v924_v17 = vrot.slane %v783_v15, 4  ;;  %v3257_v18 = vrot.slane %v815_v16, 4 }
 0x1db   : > { %860 = vrot.lane.b32.xlu1 %v794_v21, %s2765_s11  ;;  %795 = vrot.lane.b32.xlu0 %v794_v21, %s2763_s13 }
 0x1dc   : > { %927 = vst.msk [vmem:[#allocation4 + $0xc] sm:$0x1] %vm759_vm2, %v924_v17  ;;  %831 = vst.msk [vmem:[#allocation4 + $0x4] sm:$0x1] %vm759_vm2, %v3257_v18 }
 0x1df   : > { %848 = vrot.lane.b32.xlu0 %v775_v20, %s2763_s13  ;;  %789 = vrot.lane.b32.xlu1 %v788_v23, %s2763_s13 }
 0x1e3   : > { %908 = vrot.lane.b32.xlu1 %v775_v20, %s2765_s11  ;;  %767 = vrot.lane.b32.xlu0 %v766_v24, %s2764_s26 }
 0x1e7   : > { %844 = vrot.lane.b32.xlu1 %v766_v24, %s2763_s13  ;;  %805 = vrot.lane.b32.xlu0 %v804_v25, %s2765_s11 }
 0x1eb   : > { %884 = vrot.lane.b32.xlu1 %v824_v28, %s2764_s26  ;;  %856 = vrot.lane.b32.xlu0 %v788_v23, %s2765_s11 }
 0x1ef   : > { %892 = vrot.lane.b32.xlu1 %v634_v14, %s2763_s13  ;;  %944 = vrot.lane.b32.xlu0 %v824_v28, %s2763_s13 }
 0x1f3   : > { %932 = vrot.lane.b32.xlu1 %v872_v29, %s2764_s26  ;;  %880 = vrot.lane.b32.xlu0 %v820_v31, %s2764_s26 }
 0x1f7   : > { %928 = vrot.lane.b32.xlu1 %v868_v32, %s2764_s26  ;;  %904 = vrot.lane.b32.xlu0 %v766_v24, %s2765_s11 }
 0x1fb   : > { %952 = vrot.lane.b32.xlu1 %v634_v14, %s2765_s11  ;;  %940 = vrot.lane.b32.xlu0 %v820_v31, %s2763_s13  ;;  %v3253_v14 = vrot.slane %v3248_v10, 6 }
 0x1fd   : > { %v876_v19 = vrot.slane %v3253_v14, 4 }
 0x1ff   : > { %879 = vst.msk [vmem:[#allocation4 + $0x8] sm:$0x1] %vm759_vm2, %v876_v19 }
 0x241   : > { %v897_v35 = vpop.permute.xlu0 %896  ;;  %v837_v36 = vpop.permute.xlu1 %836 }
 0x242   : > { %899 = vst.msk [vmem:[#allocation3 + $0x8] sm:$0x4] %vm792_vm3, %v897_v35 }
 0x243   : > { %839 = vst.msk [vmem:[#allocation3 + $0x4] sm:$0x2] %vm770_vm4, %v837_v36 }
 0x245   : > { %v957_v37 = vpop.permute.xlu1 %956  ;;  %v833_v38 = vpop.permute.xlu0 %832 }
 0x246   : > { %959 = vst.msk [vmem:[#allocation3 + $0xc] sm:$0x8] %vm808_vm5, %v957_v37 }
 0x247   : > { %835 = vst.msk [vmem:[#allocation2 + $0x4] sm:$0x2] %vm770_vm4, %v833_v38 }
 0x249   : > { %v812_v39 = vpop.permute.xlu1 %811  ;;  %v777_v40 = vpop.permute.xlu0 %776 }
 0x24a   : > { %814 = vst.msk [vmem:[#allocation3] sm:$0x8] %vm808_vm5, %v812_v39 }
 0x24b   : > { %779 = vst.msk [vmem:[#allocation3] sm:$0x2] %vm770_vm4, %v777_v40 }
 0x24d   : > { %v861_v41 = vpop.permute.xlu1 %860  ;;  %v796_v42 = vpop.permute.xlu0 %795 }
 0x24e   : > { %863 = vst.msk [vmem:[#allocation3 + $0x4] sm:$0x8] %vm808_vm5, %v861_v41 }
 0x24f   : > { %798 = vst.msk [vmem:[#allocation3] sm:$0x4] %vm792_vm3, %v796_v42 }
 0x251   : > { %v849_v43 = vpop.permute.xlu0 %848  ;;  %v790_v44 = vpop.permute.xlu1 %789 }
 0x252   : > { %851 = vst.msk [vmem:[#allocation3 + $0x4] sm:$0x4] %vm792_vm3, %v849_v43  ;;  %793 = vst.msk [vmem:[#allocation2] sm:$0x4] %vm792_vm3, %v790_v44 }
 0x255   : > { %v909_v45 = vpop.permute.xlu1 %908  ;;  %v768_v46 = vpop.permute.xlu0 %767 }
 0x256   : > { %v968_v47 = vld [vmem:[#allocation3] sm:$0xf]  ;;  %911 = vst.msk [vmem:[#allocation3 + $0x8] sm:$0x8] %vm808_vm5, %v909_v45 }
 0x257   : > { %771 = vst.msk [vmem:[#allocation2] sm:$0x2] %vm770_vm4, %v768_v46  ;;  %v981_v48 = vsel %vm976_vm6, %v968_v47, 0 }
 0x258   : > { %2219 = vmatpush3.bf16.xpose.msra.mxu1 %v981_v48 }
 0x259   : > { %2230 = vmatprep.subr.bf16.mxu1 %v2761_v0  ;;  %v845_v49 = vpop.permute.xlu1 %844  ;;  %v806_v50 = vpop.permute.xlu0 %805  ;;  %v969_v51 = vld [vmem:[#allocation3 + $0x4] sm:$0xf] }
 0x25a   : > { %847 = vst.msk [vmem:[#allocation2 + $0x4] sm:$0x4] %vm792_vm3, %v845_v49  ;;  %v1027_v52 = vsel %vm976_vm6, %v969_v51, 0 }
 0x25b   : > { %809 = vst.msk [vmem:[#allocation2] sm:$0x8] %vm808_vm5, %v806_v50  ;;  %2225 = vmatpush3.bf16.xpose.msra.mxu0 %v1027_v52 }
 0x25c   : > { %2236 = vmatprep.subr.bf16.mxu0 %v2761_v0 }
 0x25d   : > { %v885_v53 = vpop.permute.xlu1 %884  ;;  %v857_v54 = vpop.permute.xlu0 %856 }
 0x25e   : > { %887 = vst.msk [vmem:[#allocation3 + $0x8] sm:$0x2] %vm770_vm4, %v885_v53 }
 0x25f   : > { %859 = vst.msk [vmem:[#allocation2 + $0x4] sm:$0x8] %vm808_vm5, %v857_v54 }
 0x261   : > { %v893_v55 = vpop.permute.xlu1 %892  ;;  %v945_v56 = vpop.permute.xlu0 %944 }
 0x262   : > { %v964_v57 = vld [vmem:[#allocation2] sm:$0xf]  ;;  %895 = vst.msk [vmem:[#allocation2 + $0x8] sm:$0x4] %vm792_vm3, %v893_v55  ;;  %947 = vst.msk [vmem:[#allocation3 + $0xc] sm:$0x4] %vm792_vm3, %v945_v56 }
 0x263   : > { %2221 = vmatmul.mubr.msk.bf16.vlgmr.msra.gmra.mrb[4].mxu1 %vm976_vm6, %v964_v57 }
 0x264   : > { %2232 = vmatprep.mubr.msk.bf16.mxu1 %vm2762_vm0, %v2761_v0 }
 0x265   : > { %v933_v58 = vpop.permute.xlu1 %932  ;;  %v881_v59 = vpop.permute.xlu0 %880  ;;  %v970_v61 = vld [vmem:[#allocation3 + $0x8] sm:$0xf] }
 0x266   : > { %v965_v60 = vld [vmem:[#allocation2 + $0x4] sm:$0xf]  ;;  %935 = vst.msk [vmem:[#allocation3 + $0xc] sm:$0x2] %vm770_vm4, %v933_v58  ;;  %883 = vst.msk [vmem:[#allocation2 + $0x8] sm:$0x2] %vm770_vm4, %v881_v59 }
 0x267   : > { %2227 = vmatmul.mubr.msk.bf16.vlgmr.msra.gmra.mrb[8].mxu0 %vm976_vm6, %v965_v60  ;;  %v1073_v62 = vsel %vm976_vm6, %v970_v61, 0 }
 0x268   : > { %2231 = vmatpush3.bf16.xpose.msra.mxu1 %v1073_v62  ;;  %2238 = vmatprep.mubr.msk.bf16.mxu0 %vm2762_vm0, %v2761_v0 }
 0x269   : > { %2242 = vmatprep.subr.bf16.mxu1 %v2761_v0  ;;  %v929_v63 = vpop.permute.xlu1 %928  ;;  %v905_v1 = vpop.permute.xlu0 %904 }
 0x26a   : > { %931 = vst.msk [vmem:[#allocation2 + $0xc] sm:$0x2] %vm770_vm4, %v929_v63 }
 0x26b   : > { %907 = vst.msk [vmem:[#allocation2 + $0x8] sm:$0x8] %vm808_vm5, %v905_v1 }
 0x26d   : > { %v953_v2 = vpop.permute.xlu1 %952  ;;  %v941_v3 = vpop.permute.xlu0 %940  ;;  %v971_v4 = vld [vmem:[#allocation3 + $0xc] sm:$0xf] }
 0x26e   : > { %955 = vst.msk [vmem:[#allocation2 + $0xc] sm:$0x8] %vm808_vm5, %v953_v2  ;;  %v1119_v5 = vsel %vm976_vm6, %v971_v4, 0 }
 0x26f   : > { %943 = vst.msk [vmem:[#allocation2 + $0xc] sm:$0x4] %vm792_vm3, %v941_v3  ;;  %2237 = vmatpush3.bf16.xpose.msra.mxu0 %v1119_v5 }
 0x270   : > { %2248 = vmatprep.subr.bf16.mxu0 %v2761_v0 }
 0x272   : > { %v966_v7 = vld [vmem:[#allocation2 + $0x8] sm:$0xf] }
 0x273   : > { %2233 = vmatmul.mubr.msk.bf16.vlgmr.msra.gmra.mrb[8].mxu1 %vm976_vm6, %v966_v7 }
 0x274   : > { %2244 = vmatprep.mubr.msk.bf16.mxu1 %vm2762_vm0, %v2761_v0 }
 0x276   : > { %v967_v8 = vld [vmem:[#allocation2 + $0xc] sm:$0xf] }
 0x277   : > { %2239 = vmatmul.mubr.msk.bf16.vlgmr.msra.gmra.mrb[12].mxu0 %vm976_vm6, %v967_v8 }
 0x278   : > { %2250 = vmatprep.mubr.msk.bf16.mxu0 %vm2762_vm0, %v2761_v0 }
 0x336   : > { %v1017_v20 = vpop.f32.mrb[4].mxu1 }
 0x337   : > { %v2222_v21 = vpop.f32.mrb[5].mxu1  ;;  %v1161_v22 = vsel %vm976_vm6, %v1017_v20, -inf }
 0x338   : > { %1162 = vmax.xlane.f32.xlu0 %v1161_v22  ;;  %v1020_v23 = vpop.f32.mrb[6].mxu1 }
 0x339   : > { %v2223_v24 = vpop.f32.mrb[7].mxu1 }
 0x33a   : > { %v1063_v25 = vpop.f32.mrb[8].mxu0 }
 0x33b   : > { %v2228_v26 = vpop.f32.mrb[9].mxu0  ;;  %v1164_v27 = vsel %vm976_vm6, %v1063_v25, -inf }
 0x33c   : > { %1165 = vmax.xlane.f32.xlu0 %v1164_v27  ;;  %v1066_v28 = vpop.f32.mrb[10].mxu0  ;;  %v568_v26 = vld [vmem:[%s3528_s15] sm:$0xff] }
 0x33d   : > { %v2229_v29 = vpop.f32.mrb[11].mxu0 }
 0x346   : > { %v1109_v30 = vpop.f32.mrb[8].mxu1 }
 0x347   : > { %v2234_v31 = vpop.f32.mrb[9].mxu1  ;;  %v1167_v32 = vsel %vm976_vm6, %v1109_v30, -inf }
 0x348   : > { %1168 = vmax.xlane.f32.xlu1 %v1167_v32  ;;  %v1112_v33 = vpop.f32.mrb[10].mxu1 }
 0x349   : > { %v2235_v34 = vpop.f32.mrb[11].mxu1 }
 0x34a   : > { %v1155_v35 = vpop.f32.mrb[12].mxu0 }
 0x34b   : > { %v2240_v36 = vpop.f32.mrb[13].mxu0  ;;  %v1170_v39 = vsel %vm976_vm6, %v1155_v35, -inf }
 0x34c   : > { %v1158_v37 = vpop.f32.mrb[14].mxu0 }
 0x34d   : > { %v2241_v38 = vpop.f32.mrb[15].mxu0 }
 0x352   : > { %800 = vrot.lane.b32.xlu0 %v3253_v14, %s2763_s13 }
 0x356   : > { %900 = vrot.lane.b32.xlu0 %v3248_v10, %s2763_s13 }
 0x359   : > { %784 = vrot.lane.b32.xlu1 %v783_v15, %s2764_s26 }
 0x35d   : > { %816 = vrot.lane.b32.xlu1 %v815_v16, %s2765_s11 }
 0x361   : > { %888 = vrot.lane.b32.xlu1 %v3257_v18, %s2764_s26 }
 0x365   : > { %912 = vrot.lane.b32.xlu1 %v783_v15, %s2765_s11 }
 0x369   : > { %852 = vrot.lane.b32.xlu1 %v783_v15, %s2763_s13 }
 0x375   : > { %1171 = vmax.xlane.f32.xlu0 %v1170_v39 }
 0x38b   : > { %840 = vrot.lane.b32.xlu0 %v3248_v10, %s2764_s26 }
 0x3c5   : > { %v1163_v40 = vpop.xlane.xlu0 %1162 }
 0x3c6   : > { %v1173_v41 = vsub.f32 %v1017_v20, %v1163_v40 }
 0x3c8   : > { %v1177_v42 = vmul.f32 1.442695, %v1173_v41 }
 0x3c9   : > { %v1166_v43 = vpop.xlane.xlu0 %1165 }
 0x3ca   : > { %2420 = vpow2.f32 %v1177_v42  ;;  %v1174_v44 = vsub.f32 %v1063_v25, %v1166_v43  ;;  %v1585_v42 = vld [vmem:[#allocation14] sm:$0xf] }
 0x3cb   : > { %v1593_v43 = vsel %vm1212_vm7, %v1585_v42, 0 }
 0x3cc   : > { %v1179_v45 = vmul.f32 1.442695, %v1174_v44  ;;  %v1587_v44 = vld [vmem:[#allocation14 + $0x8] sm:$0xf] }
 0x3cd   : > { %v801_v46 = vpop.permute.xlu0 %800 }
 0x3ce   : > { %2422 = vpow2.f32 %v1179_v45  ;;  %803 = vst.msk [vmem:[#allocation4] sm:$0x4] %vm792_vm3, %v801_v46 }
 0x3d1   : > { %v901_v47 = vpop.permute.xlu0 %900 }
 0x3d2   : > { %903 = vst.msk [vmem:[#allocation4 + $0x8] sm:$0x4] %vm792_vm3, %v901_v47 }
 0x3d4   : > { %v2421_v48 = vpop.eup %2420 }
 0x3d5   : > { %v1169_v49 = vpop.xlane.xlu1 %1168  ;;  %v1185_v50 = vsel %vm976_vm6, %v2421_v48, 0.0 }
 0x3d6   : > { %v1175_v51 = vsub.f32 %v1109_v30, %v1169_v49  ;;  %1186 = vadd.xlane.f32.xlu1 %v1185_v50 }
 0x3d8   : > { %v2423_v52 = vpop.eup %2422  ;;  %v1181_v53 = vmul.f32 1.442695, %v1175_v51 }
 0x3d9   : > { %v785_v54 = vpop.permute.xlu1 %784  ;;  %v1188_v55 = vsel %vm976_vm6, %v2423_v52, 0.0 }
 0x3da   : > { %2424 = vpow2.f32 %v1181_v53  ;;  %787 = vst.msk [vmem:[#allocation4] sm:$0x2] %vm770_vm4, %v785_v54  ;;  %1189 = vadd.xlane.f32.xlu1 %v1188_v55 }
 0x3dd   : > { %v817_v56 = vpop.permute.xlu1 %816 }
 0x3de   : > { %819 = vst.msk [vmem:[#allocation4] sm:$0x8] %vm808_vm5, %v817_v56 }
 0x3e1   : > { %v889_v57 = vpop.permute.xlu1 %888 }
 0x3e2   : > { %891 = vst.msk [vmem:[#allocation4 + $0x8] sm:$0x2] %vm770_vm4, %v889_v57 }
 0x3e4   : > { %v2425_v58 = vpop.eup %2424 }
 0x3e5   : > { %v913_v59 = vpop.permute.xlu1 %912  ;;  %v1191_v60 = vsel %vm976_vm6, %v2425_v58, 0.0  ;;  %v972_v61 = vld [vmem:[#allocation4] sm:$0xf] }
 0x3e6   : > { %915 = vst.msk [vmem:[#allocation4 + $0x8] sm:$0x8] %vm808_vm5, %v913_v59  ;;  %1192 = vadd.xlane.f32.xlu0 %v1191_v60  ;;  %v1214_v62 = vsel %vm1212_vm7, %v972_v61, 0  ;;  %v1586_v60 = vld [vmem:[#allocation14 + $0x4] sm:$0xf]  ;;  %v569_v61 = vld [vmem:[#allocation16] sm:$0xff] }
 0x3e7   : > { %2243 = vmatpush3.bf16.msra.mxu1 %v1214_v62 }
 0x3e8   : > { %2254 = vmatprep.subr.bf16.mxu1 %v2761_v0 }
 0x3e9   : > { %v853_v63 = vpop.permute.xlu1 %852 }
 0x3ea   : > { %855 = vst.msk [vmem:[#allocation4 + $0x4] sm:$0x4] %vm792_vm3, %v853_v63 }
 0x3eb   : > { %936 = vrot.lane.b32.xlu1 %v876_v19, %s2764_s26 }
 0x3ef   : > { %960 = vrot.lane.b32.xlu1 %v3248_v10, %s2765_s11 }
 0x3fc   : > { %864 = vrot.lane.b32.xlu0 %v3253_v14, %s2765_s11  ;;  %v974_v14 = vld [vmem:[#allocation4 + $0x8] sm:$0xf] }
 0x3fd   : > { %v1306_v16 = vsel %vm1212_vm7, %v974_v14, 0 }
 0x402   : > { %v1172_v1 = vpop.xlane.xlu0 %1171 }
 0x403   : > { %v1176_v2 = vsub.f32 %v1155_v35, %v1172_v1  ;;  %v1639_v1 = vsel %vm1212_vm7, %v1586_v60, 0 }
 0x405   : > { %v1183_v4 = vmul.f32 1.442695, %v1176_v2 }
 0x406   : > { %v841_v3 = vpop.permute.xlu0 %840 }
 0x407   : > { %843 = vst.msk [vmem:[#allocation4 + $0x4] sm:$0x2] %vm770_vm4, %v841_v3  ;;  %2426 = vpow2.f32 %v1183_v4  ;;  %v1588_v4 = vld [vmem:[#allocation14 + $0xc] sm:$0xf] }
 0x411   : > { %v2427_v5 = vpop.eup %2426 }
 0x412   : > { %v1194_v7 = vsel %vm976_vm6, %v2427_v5, 0.0 }
 0x41b   : > { %1195 = vadd.xlane.f32.xlu0 %v1194_v7 }
 0x431   : > { %948 = vrot.lane.b32.xlu0 %v3257_v18, %s2763_s13 }
 0x463   : > { %v1187_v8 = vpop.xlane.xlu1 %1186 }
 0x464   : > { %2428 = vrcp.f32 %v1187_v8 }
 0x467   : > { %v1190_v9 = vpop.xlane.xlu1 %1189 }
 0x468   : > { %2430 = vrcp.f32 %v1190_v9  ;;  %v1731_v9 = vsel %vm1212_vm7, %v1588_v4, 0 }
 0x46b   : > { %v937_v10 = vpop.permute.xlu1 %936 }
 0x46c   : > { %939 = vst.msk [vmem:[#allocation4 + $0xc] sm:$0x2] %vm770_vm4, %v937_v10 }
 0x46e   : > { %v2429_v11 = vpop.eup %2428 }
 0x46f   : > { %v1198_v12 = vmul.f32 %v2429_v11, %v2421_v48  ;;  %v961_v13 = vpop.permute.xlu1 %960  ;;  %v1685_v48 = vsel %vm1212_vm7, %v1587_v44, 0 }
 0x470   : > { %963 = vst.msk [vmem:[#allocation4 + $0xc] sm:$0x8] %vm808_vm5, %v961_v13 }
 0x471   : > { %v1205_v15 = vpack.c.bf16 %v1198_v12, %v1198_v12  ;;  %v1394_v31 = vsel %vm976_vm6, %v1198_v12, 0.0 }
 0x472   : > { %v2431_v19 = vpop.eup %2430 }
 0x473   : > { %2245 = vmatmul.mubr.msk.bf16.vlgmr.msra.gmra.mrb[12].mxu1 %vm976_vm6, %v1205_v15  ;;  %v1193_v17 = vpop.xlane.xlu0 %1192  ;;  %v1200_v21 = vmul.f32 %v2431_v19, %v2423_v52 }
 0x474   : > { %2255 = vmatpush3.bf16.msra.mxu1 %v1306_v16  ;;  %2432 = vrcp.f32 %v1193_v17  ;;  %2256 = vmatprep.mubr.msk.bf16.mxu1 %vm2762_vm0, %v2761_v0 }
 0x475   : > { %2266 = vmatprep.subr.mxu1 %v2761_v0  ;;  %v1206_v27 = vpack.c.bf16 %v1200_v21, %v1200_v21  ;;  %v1395_v30 = vsel %vm976_vm6, %v1200_v21, 0.0 }
 0x476   : > { %v1396_v34 = vadd.f32 %v1395_v30, %v1394_v31 }
 0x477   : > { %v865_v18 = vpop.permute.xlu0 %864 }
 0x478   : > { %867 = vst.msk [vmem:[#allocation4 + $0x4] sm:$0x8] %vm808_vm5, %v865_v18 }
 0x47e   : > { %v2433_v20 = vpop.eup %2432 }
 0x47f   : > { %v1202_v22 = vmul.f32 %v2433_v20, %v2425_v58  ;;  %v973_v23 = vld [vmem:[#allocation4 + $0x4] sm:$0xf] }
 0x480   : > { %v1260_v24 = vsel %vm1212_vm7, %v973_v23, 0 }
 0x481   : > { %2249 = vmatpush3.bf16.msra.mxu0 %v1260_v24  ;;  %v1207_v25 = vpack.c.bf16 %v1202_v22, %v1202_v22  ;;  %v1397_v32 = vsel %vm976_vm6, %v1202_v22, 0.0 }
 0x482   : > { %2260 = vmatprep.subr.bf16.mxu0 %v2761_v0  ;;  %v1398_v38 = vadd.f32 %v1397_v32, %v1396_v34 }
 0x483   : > { %2257 = vmatmul.mubr.msk.bf16.vlgmr.msra.gmra.mrb[16].mxu1 %vm976_vm6, %v1207_v25 }
 0x484   : > { %2251 = vmatmul.mubr.msk.bf16.vlgmr.msra.gmra.mrb[16].mxu0 %vm976_vm6, %v1206_v27  ;;  %2267 = vmatpush3.msra.mxu1 %v568_v26 }
 0x485   : > { %2262 = vmatprep.mubr.msk.bf16.mxu0 %vm2762_vm0, %v2761_v0  ;;  %2268 = vmatprep.mubr.msk.f32.mxu1 %vm2762_vm0, %v2761_v0 }
 0x486   : > { %2271 = vmatprep.subr.mxu1 %v2761_v0 }
 0x4a8   : > { %v1196_v28 = vpop.xlane.xlu0 %1195 }
 0x4a9   : > { %2434 = vrcp.f32 %v1196_v28 }
 0x4ac   : > { %v949_v29 = vpop.permute.xlu0 %948 }
 0x4ad   : > { %951 = vst.msk [vmem:[#allocation4 + $0xc] sm:$0x4] %vm792_vm3, %v949_v29 }
 0x4b3   : > { %v2435_v33 = vpop.eup %2434 }
 0x4b4   : > { %v1204_v35 = vmul.f32 %v2435_v33, %v2427_v5  ;;  %v975_v36 = vld [vmem:[#allocation4 + $0xc] sm:$0xf] }
 0x4b5   : > { %v1352_v37 = vsel %vm1212_vm7, %v975_v36, 0 }
 0x4b6   : > { %2261 = vmatpush3.bf16.msra.mxu0 %v1352_v37  ;;  %v1208_v39 = vpack.c.bf16 %v1204_v35, %v1204_v35  ;;  %v1399_v40 = vsel %vm976_vm6, %v1204_v35, 0.0 }
 0x4b7   : > { %v1400_v41 = vadd.f32 %v1399_v40, %v1398_v38  ;;  %2276 = vmatprep.subr.bf16.mxu0 %v2761_v0 }
 0x4b9   : > { %2263 = vmatmul.mubr.msk.bf16.vlgmr.msra.gmra.mrb[20].mxu0 %vm976_vm6, %v1208_v39  ;;  %2269 = vmatmul.mubr.msk.f32.vlgmr.msra.gmra.mrb[20].mxu1 %vm976_vm6, %v1400_v41 }
 0x4ba   : > { %2278 = vmatprep.mubr.msk.bf16.mxu0 %vm2762_vm0, %v2761_v0  ;;  %2273 = vmatprep.mubr.msk.f32.mxu1 %vm2762_vm0, %v2761_v0 }
 0x4bb   : > { %2277 = vmatpush3.bf16.msra.mxu0 %v1593_v43 }
 0x4bc   : > { %2288 = vmatprep.subr.bf16.mxu0 %v2761_v0 }
 0x546   : > { %v1250_v45 = vpop.f32.mrb[12].mxu1 }
 0x547   : > { %v1581_v46 = vpack.c.bf16 %v1250_v45, %v1250_v45  ;;  %v2246_v47 = vpop.f32.mrb[13].mxu1 }
 0x548   : > { %v1253_v49 = vpop.f32.mrb[14].mxu1 }
 0x549   : > { %v2247_v50 = vpop.f32.mrb[15].mxu1  ;;  %2279 = vmatmul.mubr.msk.bf16.vlgmr.msra.gmra.mrb[24].mxu0 %vm976_vm6, %v1581_v46 }
 0x54a   : > { %2289 = vmatpush3.bf16.msra.mxu0 %v1685_v48  ;;  %2290 = vmatprep.mubr.msk.bf16.mxu0 %vm2762_vm0, %v2761_v0 }
 0x54b   : > { %2300 = vmatprep.subr.mxu0 %v2761_v0 }
 0x556   : > { %v1342_v51 = vpop.f32.mrb[16].mxu1 }
 0x557   : > { %v1583_v52 = vpack.c.bf16 %v1342_v51, %v1342_v51  ;;  %v1296_v53 = vpop.f32.mrb[16].mxu0  ;;  %v2258_v54 = vpop.f32.mrb[17].mxu1 }
 0x558   : > { %v2252_v55 = vpop.f32.mrb[17].mxu0  ;;  %v1345_v56 = vpop.f32.mrb[18].mxu1  ;;  %v1582_v8 = vpack.c.bf16 %v1296_v53, %v1296_v53 }
 0x559   : > { %v1299_v57 = vpop.f32.mrb[18].mxu0  ;;  %v2259_v58 = vpop.f32.mrb[19].mxu1  ;;  %2291 = vmatmul.mubr.msk.bf16.vlgmr.msra.gmra.mrb[28].mxu0 %vm976_vm6, %v1583_v52 }
 0x55a   : > { %v2253_v59 = vpop.f32.mrb[19].mxu0  ;;  %2302 = vmatprep.mubr.msk.f32.mxu0 %vm2762_vm0, %v2761_v0 }
 0x58c   : > { %v1388_v62 = vpop.f32.mrb[20].mxu0  ;;  %v1470_v63 = vpop.f32.mrb[20].mxu1 }
 0x58d   : > { %v2264_v2 = vpop.f32.mrb[21].mxu0  ;;  %v2270_v3 = vpop.f32.mrb[21].mxu1  ;;  %2272 = vmatpush3.msra.mxu1 %v1470_v63  ;;  %v1584_v10 = vpack.c.bf16 %v1388_v62, %v1388_v62 }
 0x58e   : > { %v1391_v5 = vpop.f32.mrb[22].mxu0  ;;  %2274 = vmatmul.mubr.msk.f32.vlgmr.msra.gmra.mrb[22].mxu1 %vm976_vm6, %v569_v61  ;;  %2282 = vmatprep.subr.bf16.mxu1 %v2761_v0 }
 0x58f   : > { %v2265_v7 = vpop.f32.mrb[23].mxu0  ;;  %2283 = vmatpush3.bf16.msra.mxu1 %v1639_v1  ;;  %2284 = vmatprep.mubr.msk.bf16.mxu1 %vm2762_vm0, %v2761_v0 }
 0x590   : > { %2294 = vmatprep.subr.bf16.mxu1 %v2761_v0 }
 0x592   : > { %2285 = vmatmul.mubr.msk.bf16.vlgmr.msra.gmra.mrb[24].mxu1 %vm976_vm6, %v1582_v8 }
 0x593   : > { %2295 = vmatpush3.bf16.msra.mxu1 %v1731_v9  ;;  %2296 = vmatprep.mubr.msk.bf16.mxu1 %vm2762_vm0, %v2761_v0 }
 0x59a   : > { %2297 = vmatmul.mubr.msk.bf16.vlgmr.msra.gmra.mrb[28].mxu1 %vm976_vm6, %v1584_v10 }
 0x61c   : > { %v1629_v11 = vpop.f32.mrb[24].mxu0 }
 0x61d   : > { %v2280_v12 = vpop.f32.mrb[25].mxu0  ;;  %v1773_v22 = vsel %vm590_vm1, %v1629_v11, 0.0 }
 0x61e   : > { %v1632_v13 = vpop.f32.mrb[26].mxu0 }
 0x61f   : > { %v2281_v14 = vpop.f32.mrb[27].mxu0 }
 0x62c   : > { %v1721_v15 = vpop.f32.mrb[28].mxu0 }
 0x62d   : > { %v2292_v16 = vpop.f32.mrb[29].mxu0  ;;  %v1776_v26 = vsel %vm590_vm1, %v1721_v15, 0.0 }
 0x62e   : > { %v1724_v17 = vpop.f32.mrb[30].mxu0 }
 0x62f   : > { %v2293_v18 = vpop.f32.mrb[31].mxu0 }
 0x661   : > { %v1543_v19 = vpop.f32.mrb[22].mxu1 }
 0x662   : > { %v2275_v20 = vpop.f32.mrb[23].mxu1 }
 0x665   : > { %v1675_v21 = vpop.f32.mrb[24].mxu1 }
 0x666   : > { %v1774_v23 = vsel %vm590_vm1, %v1675_v21, 0.0  ;;  %v2286_v24 = vpop.f32.mrb[25].mxu1 }
 0x667   : > { %v1775_v0 = vadd.f32 %v1774_v23, %v1773_v22  ;;  %v1678_v25 = vpop.f32.mrb[26].mxu1 }
 0x668   : > { %v2287_v27 = vpop.f32.mrb[27].mxu1 }
 0x669   : > { %v1777_v28 = vadd.f32 %v1776_v26, %v1775_v0 }
 0x66d   : > { %v1767_v29 = vpop.f32.mrb[28].mxu1 }
 0x66e   : > { %v1778_v30 = vsel %vm590_vm1, %v1767_v29, 0.0  ;;  %v2298_v31 = vpop.f32.mrb[29].mxu1 }
 0x66f   : > { %v1779_v32 = vadd.f32 %v1778_v30, %v1777_v28  ;;  %v1770_v33 = vpop.f32.mrb[30].mxu1 }
 0x670   : > { %v2299_v34 = vpop.f32.mrb[31].mxu1 }
 0x671   : > { %2301 = vmatpush3.msra.mxu0 %v1779_v32 }
 0x672   : > { %2303 = vmatmul.mubr.msk.f32.vlgmr.msra.gmra.mrb[32].mxu0 %vm976_vm6, %v569_v61 }
 0x745   : > { %v1846_v35 = vpop.f32.mrb[32].mxu0 }
 0x746   : > { %v1847_v36 = vadd.f32 %v1846_v35, %v3147_v6  ;;  %v2304_v37 = vpop.f32.mrb[33].mxu0 }
 0x748   : > { %v1850_v38 = vsel %vm590_vm1, %v1847_v36, 0.0 }
 0x749   : > { %1851 = vadd.xlane.f32.xlu0 %v1850_v38 }
 0x776   : > { %1547 = vxpose.xlu0.b32.start.end [1/1] (short) (narrow) %v1543_v19, 8 }
 0x7d6   : > { %v1852_v39 = vpop.xlane.xlu0 %1851 }
 0x7d7   : > { %v1854_v40 = vmul.f32 0.03125, %v1852_v39 }
 0x7d9   : > { %v1855_v41 = vsub.f32 %v1847_v36, %v1854_v40 }
 0x7db   : > { %v1856_v42 = vmul.f32 %v1855_v41, %v1855_v41 }
 0x7dd   : > { %v1857_v43 = vsel %vm590_vm1, %v1856_v42, 0.0 }
 0x7de   : > { %1858 = vadd.xlane.f32.xlu1 %v1857_v43 }
 0x7f6   : > { %v1563_v44 = vpop.trf.xlu0 }
 0x7f7   : > { %v1579_v45 = vmul.f32 0.25, %v1563_v44 }
 0x7f9   : > { %1580 = vst.msk [vmem:[%s566_s10] sm:$0xff] %vm976_vm6, %v1579_v45 }
 0x7fa   : > { %2653 = shalt.err (!%p2650_p4)
}
 0x7fb   : > { %s2654_s13 = scalar_lea.hbm %s3375_s7, 128  ;;  %s2658_s18 = scalar_lea.hbm %s3530_s1, 256 }
 0x7fc   : > { %p2655_p10 = scmp.ne.s32.totalorder %s3375_s7, %s2654_s13  ;;  %p2659_p12 = scmp.lt.u32.totalorder %s3375_s7, %s3530_s1 }
 0x7fd   : > { %p2660_p0 = scmp.lt.u32.totalorder %s2658_s18, %s2654_s13  ;;  %p2662_p9 = scmp.lt.u32.totalorder %s2654_s13, %s3375_s7 }
 0x7fe   : > { %p2656_p3 = pnand %p2655_p10, %p3531_p13 }
 0x7ff   : > { %p2661_p7 = por %p2660_p0, %p2659_p12 }
 0x800   : > { %p2657_p8 = pneg %p2656_p3 }
 0x801   : > { %p2663_p11 = por %p2662_p9, %p2661_p7 }
 0x803   : > { %p2664_p1 = pnand %p2663_p11, %p2657_p8 }
 0x805   : > { %2667 = shalt.err (!%p2664_p1)
}
 0x806   : > { %2328 = dma.vmem_to_hbm [thread:$0]  (%p3531_p13), %s1912_s28, 128, %s3375_s7, %s1885_s16  }
 0x807   : > { %s3532_s10 = sld [smem:[#allocation36_spill]]  ;;  %s3533_s17 = sld [smem:[#allocation37_spill]] }
 0x808   : > { %s559_s29 = scalar_lea.vmem [#allocation17], %s3116_s12  ;;  %s3534_s16 = sld [smem:[#allocation38_spill]] }
 0x809   : > { %s1898_s25 = sshll.u32 %s559_s29, 4  ;;  %s1880_s13 = scalar_lea.sflag [#allocation7], %s3113_s14  ;;  %s3409_s25 = int_to_ptr.vmem [resolvable:$true] %s1898_s25 }
 0x80a   : > { %s2668_s26 = scalar_lea.vmem %s3409_s25, 128  ;;  %s2767_s12 = smov [#allocation17]  }
 0x80b   : > { %p2669_p6 = scmp.ne.s32.totalorder %s3409_s25, %s2668_s26  ;;  %s2672_s27 = sshll.u32 %s2767_s12, 4  ;;  %s2673_s27 = int_to_ptr.vmem [resolvable:$false] %s2672_s27 }
 0x80c   : > { %s2674_s6 = scalar_lea.vmem %s2673_s27, 256  ;;  %p2675_p4 = scmp.lt.s32.totalorder %s3409_s25, %s2673_s27 }
 0x80d   : > { %v2144_v49 = vld [vmem:[%s3532_s10] ss:$0 sm:$0xff]  ;;  %p2670_p5 = pnand %p2669_p6, %p3531_p13  ;;  %p2676_p10 = scmp.lt.s32.totalorder %s2674_s6, %s2668_s26 }
 0x80e   : > { %v2145_v51 = vld [vmem:[%s3533_s17] ss:$0 sm:$0xff]  ;;  %s3407_s3 = scalar_lea.hbm %s3534_s16, %s2148_s9 }
 0x80f   : > { %p2671_p2 = pneg %p2670_p5  ;;  %p2677_p3 = por %p2676_p10, %p2675_p4 }
 0x811   : > { %p2678_p8 = pnand %p2677_p3, %p2671_p2 }
 0x86b   : > { %v1859_v6 = vpop.xlane.xlu1 %1858 }
 0x86c   : > { %v1860_v46 = vmul.f32 0.03125, %v1859_v6 }
 0x86e   : > { %v1861_v47 = vadd.f32 1e-05, %v1860_v46 }
 0x870   : > { %2436 = vrsqrt.f32 %v1861_v47 }
 0x87a   : > { %v2437_v48 = vpop.eup %2436 }
 0x87b   : > { %v1863_v50 = vmul.f32 %v2437_v48, %v1855_v41 }
 0x87d   : > { %v1870_v52 = vmul.f32 %v2144_v49, %v1863_v50 }
 0x87f   : > { %v1877_v53 = vadd.f32 %v2145_v51, %v1870_v52 }
 0x881   : > { %1878 = vst.msk [vmem:[%s559_s29] sm:$0xff] %vm590_vm1, %v1877_v53 }
 0x882   : > { %2681 = shalt.err (!%p2678_p8)
}
 0x883   : > { %s2682_s14 = scalar_lea.hbm %s3407_s3, 128  ;;  %s2686_s11 = scalar_lea.hbm %s3534_s16, 256 }
 0x884   : > { %p2683_p12 = scmp.ne.s32.totalorder %s3407_s3, %s2682_s14  ;;  %p2687_p9 = scmp.lt.u32.totalorder %s3407_s3, %s3534_s16 }
 0x885   : > { %p2688_p11 = scmp.lt.u32.totalorder %s2686_s11, %s2682_s14  ;;  %p2690_p6 = scmp.lt.u32.totalorder %s2682_s14, %s3407_s3 }
 0x886   : > { %p2684_p0 = pnand %p2683_p12, %p3531_p13 }
 0x887   : > { %p2689_p1 = por %p2688_p11, %p2687_p9 }
 0x888   : > { %p2685_p7 = pneg %p2684_p0 }
 0x889   : > { %p2691_p5 = por %p2690_p6, %p2689_p1 }
 0x88b   : > { %p2692_p2 = pnand %p2691_p5, %p2685_p7 }
 0x88d   : > { %2695 = shalt.err (!%p2692_p2)
}
 0x88e   : > { %2327 = dma.vmem_to_hbm [thread:$0]  (%p3531_p13), %s3409_s25, 128, %s3407_s3, %s1880_s13  }
 0x88f PF: > { %s3535_s15 = sld [smem:[#allocation26_spill]]  ;;  %s3536_s10 = sld [smem:[#allocation31_spill]] }
 0x890   : > { %s3537_s21 = sld [smem:[#allocation27_spill]] }
 0x895   : > { %s1923_s20 = sand.u32 1, %s3535_s15   ;;  %p3538_p4 = scmp.ne.s32.totalorder %s3536_s10, 0 }
 0x896   : > { %p3539_p10 = scmp.ge.s32.totalorder %s3537_s21, 2  ;;  %s1924_s17 = scalar_lea.sflag [#allocation7], %s1923_s20 }
 0x898   : > { %p2355_p3 = pnand %p3539_p10, %p3538_p4 }
 0x89a   : > { %2729 = dma.done.wait (!%p2355_p3), %s1924_s17, 128  }
 0x89b   : > { %2731 = vsyncadd (!%p2355_p3), %s1924_s17, 4294967168  ;;  %s1933_s29 = scalar_lea.sflag [#allocation19], %s1923_s20 }
 0x89c   : > { %2733 = dma.done.wait (!%p2355_p3), %s1933_s29, 128  }
 0x89d   : > { %2735 = vsyncadd (!%p2355_p3), %s1933_s29, 4294967168  ;;  %s3540_s24 = sld [smem:[#allocation28_spill]]  ;;  %s3541_s7 = sld [smem:[#allocation29_spill]] }
 0x89e   : > { %s3542_s21 = smov %s2742_s22  ;;  %s3543_s22 = smov %s2746_s23 }
 0x8a3   : > { %p34_p13 = scmp.ge.s32.totalorder %s3540_s24, 4   ;;  %s3544_s23 = smov %s3541_s7 }
 0x8a5   :  { %36 = sbr.rel (!%p34_p13) target bundleno = 20 (0x14), region = 175 }
 0x8ac   :  { %1938 = vsyncpa [#allocation6], 1 }
 0x8ad   :  { %1940 = vsyncpa [#allocation6 + $0x1], 1 }
 0x8ae   :  { %1941 = vsyncpa [#allocation9], 1 }
 0x8af   :  { %1943 = vsyncpa [#allocation9 + $0x1], 1 }
 0x8b0   :  { %1944 = vsyncpa [#allocation12], 1 }
 0x8b1   :  { %1945 = vsyncpa [#allocation15], 1 }
 0x8b2   :  { %1946 = vsyncpa [#allocation7], 1 }
 0x8b3   :  { %1948 = vsyncpa [#allocation7 + $0x1], 1 }
 0x8b4   :  { %1949 = vsyncpa [#allocation19], 1 }
 0x8b5   :  { %1951 = vsyncpa [#allocation19 + $0x1], 1 }

</bundles_post_ra>
